<compile_context>
chip_gen: v5e
topology: v5e:2x2
jax: 0.10.0
libtpu: 0.0.40
codegen_flags: <defaults>
</compile_context>

<pallas_src>
import functools

import jax
import jax.numpy as jnp
from jax import lax
from jax.experimental import pallas as pl
from jax.experimental.pallas import tpu as pltpu

_LANES = 128


def _round_up(x, m):
    return (x + m - 1) // m * m


def _struct_reg_kernel(er_ref, ec_ref, code_ref, out_ref, acc_ref):
    # er_ref: (TM, Dp) row-tile embeddings, ec_ref: (TN, Dp) col-tile embeddings
    # code_ref: (TM, TN) int8 packed masks, out_ref/acc_ref: (TM, 128) f32
    j = pl.program_id(1)

    @pl.when(j == 0)
    def _():
        acc_ref[...] = jnp.zeros_like(acc_ref)

    er = er_ref[...]
    ec = ec_ref[...]
    # logits[i, j] = <er[i], ec[j]>  -- contract last dim of both, no transpose.
    logits = lax.dot_general(
        er, ec, (((1,), (1,)), ((), ())), preferred_element_type=jnp.float32)

    # sigmoid via a single tanh (1 EUP op/elem instead of exp + reciprocal)
    s = 0.5 * jnp.tanh(0.5 * logits) + 0.5

    # decode packed masks: code = 2*pos_count + neg_flag
    code = code_ref[...].astype(jnp.int32)
    b = (code >> 1).astype(jnp.float32)                # pos edge count
    a = b + (code & 1).astype(jnp.float32)             # pos + neg

    # pos*(s-1)^2 + neg*s^2 = a*s^2 - 2*b*s + pos  (constant sum(pos) added outside)
    contrib = s * (a * s - 2.0 * b)                    # (TM, TN)

    # Reduce the TN axis onto 128 lanes with pure VPU adds over lane-aligned
    # static slices (no XLU cross-lane reduction inside the grid loop).
    tn = contrib.shape[1]
    part = contrib[:, 0:_LANES]
    for c in range(1, tn // _LANES):
        part = part + contrib[:, c * _LANES:(c + 1) * _LANES]
    acc_ref[...] += part

    @pl.when(j == pl.num_programs(1) - 1)
    def _():
        out_ref[...] = acc_ref[...]


def structural_regularization_pallas(embeddings, code, pos_sum, num_nodes,
                                     *, tile=256, matmul_dtype=jnp.float32):
    """embeddings: (N, D); code: (N, N) int8 packed masks (2*pos+neg);
    pos_sum: scalar sum of pos counts. Returns scalar loss."""
    N = code.shape[0]
    D = embeddings.shape[1]

    n_pad = _round_up(N, tile)
    d_pad = _round_up(D, _LANES)

    # Pad with zeros: padded rows/cols have zero masks -> contribute exactly 0,
    # and zero embeddings keep sigmoid finite (no NaN * 0).
    emb = embeddings.astype(matmul_dtype)
    emb = jnp.pad(emb, ((0, n_pad - N), (0, d_pad - D)))
    code_p = jnp.pad(code, ((0, n_pad - N), (0, n_pad - N)))

    gi = n_pad // tile
    gj = n_pad // tile

    partials = pl.pallas_call(
        _struct_reg_kernel,
        out_shape=jax.ShapeDtypeStruct((n_pad, _LANES), jnp.float32),
        grid_spec=pltpu.PrefetchScalarGridSpec(
            num_scalar_prefetch=0,
            grid=(gi, gj),
            in_specs=[
                pl.BlockSpec((tile, d_pad), lambda i, j: (i, 0)),   # row embeddings
                pl.BlockSpec((tile, d_pad), lambda i, j: (j, 0)),   # col embeddings
                pl.BlockSpec((tile, tile), lambda i, j: (i, j)),    # packed masks
            ],
            out_specs=pl.BlockSpec((tile, _LANES), lambda i, j: (i, 0)),
            scratch_shapes=[pltpu.VMEM((tile, _LANES), jnp.float32)],
        ),
        compiler_params=pltpu.CompilerParams(
            # row tiles independent -> shard across TensorCores; column axis is
            # the accumulation axis -> arbitrary.
            dimension_semantics=("parallel", "arbitrary"),
            # explicit limit with headroom for v7x's 64 MiB physical VMEM
            vmem_limit_bytes=48 * 1024 * 1024,
        ),
    )(emb, emb, code_p)

    # add the constant Σpos from the algebraic fusion, divide by the TRUE N
    return (jnp.sum(partials) + pos_sum) / jnp.float32(num_nodes)


def build_masks(edge_index, num_nodes, k, key):
    """Positive edge-count matrix and k-negative-sample mask (dense f32)."""
    src, dst = edge_index[0], edge_index[1]
    pos = jnp.zeros((num_nodes, num_nodes), jnp.float32).at[src, dst].add(1.0)

    has_nbr = (pos.sum(axis=1) > 0).astype(jnp.float32)
    non_nbr = (pos == 0)
    # TODO(synk): torch.randperm ordering is not bit-reproducible; Gumbel-top-k
    # is an equivalent deterministic uniform-without-replacement sampler.
    g = jax.random.gumbel(key, (num_nodes, num_nodes))
    scores = jnp.where(non_nbr, g, -jnp.inf)
    _, idx = jax.lax.top_k(scores, k)
    neg = jnp.zeros((num_nodes, num_nodes), jnp.float32)
    neg = neg.at[jnp.arange(num_nodes)[:, None], idx].set(1.0)
    neg = neg * non_nbr.astype(jnp.float32)   # guard vs -inf picks
    neg = neg * has_nbr[:, None]              # skip nodes with no neighbors
    return pos, neg


def pack_masks(pos, neg):
    """Pack both masks into one int8 array: code = 2*pos_count + neg_flag."""
    code = (2.0 * pos + neg).astype(jnp.int8)     # pos multiplicity <= 63 assumed
    pos_sum = jnp.sum(pos)
    return code, pos_sum


def reference_loss(embeddings, pos, neg):
    sim = jax.nn.sigmoid(embeddings @ embeddings.T)
    loss = jnp.sum(pos * (sim - 1.0) ** 2 + neg * sim ** 2)
    return loss / embeddings.shape[0]


if __name__ == "__main__":
    key = jax.random.PRNGKey(0)
    k_emb, k_neg, k_emb2, k_src, k_dst, k_neg2 = jax.random.split(key, 6)

    # --- test 1: small ring graph (matches the module's toy usage) ------------
    N, D, K = 8, 32, 5
    embeddings = jax.random.normal(k_emb, (N, D), dtype=jnp.float32)
    src = jnp.array([0, 1, 2, 3, 4, 5, 6, 7, 1, 2, 3, 4, 5, 6, 7, 0], jnp.int32)
    dst = jnp.array([1, 2, 3, 4, 5, 6, 7, 0, 0, 1, 2, 3, 4, 5, 6, 7], jnp.int32)
    edge_index = jnp.stack([src, dst])

    pos, neg = build_masks(edge_index, N, K, k_neg)
    code, pos_sum = pack_masks(pos, neg)

    loss = structural_regularization_pallas(embeddings, code, pos_sum, N)
    loss = jax.block_until_ready(loss)
    ref = reference_loss(embeddings, pos, neg)
    assert jnp.allclose(loss, ref, rtol=1e-4, atol=1e-4), (loss, ref)

    # bf16 MXU operands (v6e/v7x-native); f32 accumulation -> looser tolerance
    loss_bf16 = structural_regularization_pallas(
        embeddings, code, pos_sum, N, matmul_dtype=jnp.bfloat16)
    loss_bf16 = jax.block_until_ready(loss_bf16)
    assert jnp.allclose(loss_bf16, ref, rtol=5e-2, atol=5e-2), (loss_bf16, ref)

    # --- test 2: larger random graph, exercises the 2D grid / accumulator -----
    N2, D2, K2, E2 = 300, 48, 5, 600
    emb2 = jax.random.normal(k_emb2, (N2, D2), dtype=jnp.float32) * 0.5
    src2 = jax.random.randint(k_src, (E2,), 0, N2, dtype=jnp.int32)
    dst2 = jax.random.randint(k_dst, (E2,), 0, N2, dtype=jnp.int32)
    pos2, neg2 = build_masks(jnp.stack([src2, dst2]), N2, K2, k_neg2)
    code2, pos_sum2 = pack_masks(pos2, neg2)

    loss2 = structural_regularization_pallas(emb2, code2, pos_sum2, N2)
    loss2 = jax.block_until_ready(loss2)
    ref2 = reference_loss(emb2, pos2, neg2)
    assert jnp.allclose(loss2, ref2, rtol=1e-4, atol=1e-4), (loss2, ref2)

    print("KERNEL_OK")
</pallas_src>

<mosaic_0001>
module attributes {stable_mosaic.version = 11 : i64} {
  func.func @_struct_reg_kernel(%arg0: i32, %arg1: i32, %arg2: memref<256x128xf32, #tpu.memory_space<vmem>>, %arg3: memref<256x128xf32, #tpu.memory_space<vmem>>, %arg4: memref<256x256xi8, #tpu.memory_space<vmem>>, %arg5: memref<256x128xf32, #tpu.memory_space<vmem>>, %arg6: memref<256x128xf32, #tpu.memory_space<vmem>>) attributes {dimension_semantics = [#tpu.dimension_semantics<parallel>, #tpu.dimension_semantics<arbitrary>], iteration_bounds = array<i64: 1, 1>, scalar_prefetch = 0 : i64, scratch_operands = 1 : i64, tpu.core_type = #tpu.core_type<tc>, window_params = [{transform_indices = @transform_0, window_bounds = array<i64: 256, 128>}, {transform_indices = @transform_1, window_bounds = array<i64: 256, 128>}, {transform_indices = @transform_2, window_bounds = array<i64: 256, 256>}, {transform_indices = @transform_3, window_bounds = array<i64: 256, 128>}]} {
    %c0_i32 = arith.constant 0 : i32
    %0 = arith.cmpi eq, %arg1, %c0_i32 : i32
    %1 = arith.extui %0 : i1 to i32
    %c0_i32_0 = arith.constant 0 : i32
    %2 = arith.cmpi ne, %1, %c0_i32_0 : i32
    scf.if %2 {
      %cst_17 = arith.constant 0.000000e+00 : f32
      %36 = vector.broadcast %cst_17 : f32 to vector<256x128xf32>
      %c0_18 = arith.constant 0 : index
      %c0_19 = arith.constant 0 : index
      %37 = vector.load %arg6[%c0_18, %c0_19] : memref<256x128xf32, #tpu.memory_space<vmem>>, vector<256x128xf32>
      tpu.vector_store %arg6[%c0_18, %c0_19], %36 {strides = array<i32>} : memref<256x128xf32, #tpu.memory_space<vmem>>, vector<256x128xf32>,
    } else {
    }
    %c0 = arith.constant 0 : index
    %c0_1 = arith.constant 0 : index
    %3 = vector.load %arg2[%c0, %c0_1] : memref<256x128xf32, #tpu.memory_space<vmem>>, vector<256x128xf32>
    %c0_2 = arith.constant 0 : index
    %c0_3 = arith.constant 0 : index
    %4 = vector.load %arg3[%c0_2, %c0_3] : memref<256x128xf32, #tpu.memory_space<vmem>>, vector<256x128xf32>
    %cst = arith.constant dense<0.000000e+00> : vector<256x256xf32>
    %5 = tpu.matmul %3, %4, %cst {dimension_numbers = #tpu.dot_dimension_numbers<[1], [1], [0], [0], [0, 0, 1, 0], [], []>} : vector<256x128xf32>, vector<256x128xf32>, vector<256x256xf32> -> vector<256x256xf32>
    %cst_4 = arith.constant 5.000000e-01 : f32
    %6 = vector.broadcast %cst_4 : f32 to vector<256x256xf32>
    %7 = arith.mulf %6, %5 : vector<256x256xf32>
    %8 = math.tanh %7 : vector<256x256xf32>
    %cst_5 = arith.constant 5.000000e-01 : f32
    %9 = vector.broadcast %cst_5 : f32 to vector<256x256xf32>
    %10 = arith.mulf %9, %8 : vector<256x256xf32>
    %cst_6 = arith.constant 5.000000e-01 : f32
    %11 = vector.broadcast %cst_6 : f32 to vector<256x256xf32>
    %12 = arith.addf %10, %11 : vector<256x256xf32>
    %c0_7 = arith.constant 0 : index
    %c0_8 = arith.constant 0 : index
    %13 = vector.load %arg4[%c0_7, %c0_8] : memref<256x256xi8, #tpu.memory_space<vmem>>, vector<256x256xi8>
    %14 = arith.extsi %13 : vector<256x256xi8> to vector<256x256xi32>
    %c1_i32 = arith.constant 1 : i32
    %15 = vector.broadcast %c1_i32 : i32 to vector<256x256xi32>
    %16 = arith.shrsi %14, %15 : vector<256x256xi32>
    %17 = arith.sitofp %16 : vector<256x256xi32> to vector<256x256xf32>
    %c1_i32_9 = arith.constant 1 : i32
    %18 = vector.broadcast %c1_i32_9 : i32 to vector<256x256xi32>
    %19 = arith.andi %14, %18 : vector<256x256xi32>
    %20 = arith.sitofp %19 : vector<256x256xi32> to vector<256x256xf32>
    %21 = arith.addf %17, %20 : vector<256x256xf32>
    %22 = arith.mulf %21, %12 : vector<256x256xf32>
    %cst_10 = arith.constant 2.000000e+00 : f32
    %23 = vector.broadcast %cst_10 : f32 to vector<256x256xf32>
    %24 = arith.mulf %23, %17 : vector<256x256xf32>
    %25 = arith.subf %22, %24 : vector<256x256xf32>
    %26 = arith.mulf %12, %25 : vector<256x256xf32>
    %27 = vector.extract_strided_slice %26 {offsets = [0, 0], sizes = [256, 128], strides = [1, 1]} : vector<256x256xf32> to vector<256x128xf32>
    %28 = vector.extract_strided_slice %26 {offsets = [0, 128], sizes = [256, 128], strides = [1, 1]} : vector<256x256xf32> to vector<256x128xf32>
    %29 = arith.addf %27, %28 : vector<256x128xf32>
    %c0_11 = arith.constant 0 : index
    %c0_12 = arith.constant 0 : index
    %30 = vector.load %arg6[%c0_11, %c0_12] : memref<256x128xf32, #tpu.memory_space<vmem>>, vector<256x128xf32>
    %31 = arith.addf %30, %29 : vector<256x128xf32>
    %c0_13 = arith.constant 0 : index
    %c0_14 = arith.constant 0 : index
    %32 = vector.load %arg6[%c0_13, %c0_14] : memref<256x128xf32, #tpu.memory_space<vmem>>, vector<256x128xf32>
    tpu.vector_store %arg6[%c0_13, %c0_14], %31 {strides = array<i32>} : memref<256x128xf32, #tpu.memory_space<vmem>>, vector<256x128xf32>,
    %c0_i32_15 = arith.constant 0 : i32
    %33 = arith.cmpi eq, %arg1, %c0_i32_15 : i32
    %34 = arith.extui %33 : i1 to i32
    %c0_i32_16 = arith.constant 0 : i32
    %35 = arith.cmpi ne, %34, %c0_i32_16 : i32
    scf.if %35 {
      %c0_17 = arith.constant 0 : index
      %c0_18 = arith.constant 0 : index
      %36 = vector.load %arg6[%c0_17, %c0_18] : memref<256x128xf32, #tpu.memory_space<vmem>>, vector<256x128xf32>
      %c0_19 = arith.constant 0 : index
      %c0_20 = arith.constant 0 : index
      %37 = vector.load %arg5[%c0_19, %c0_20] : memref<256x128xf32, #tpu.memory_space<vmem>>, vector<256x128xf32>
      tpu.vector_store %arg5[%c0_19, %c0_20], %36 {strides = array<i32>} : memref<256x128xf32, #tpu.memory_space<vmem>>, vector<256x128xf32>,
    } else {
    }
    return
  }
  func.func @transform_0(%arg0: i32, %arg1: i32) -> (i32, i32) {
    %c0_i32 = arith.constant 0 : i32
    %c0_i32_0 = arith.constant 0 : i32
    return %arg0, %c0_i32 : i32, i32
  }
  func.func @transform_1(%arg0: i32, %arg1: i32) -> (i32, i32) {
    %c0_i32 = arith.constant 0 : i32
    %c0_i32_0 = arith.constant 0 : i32
    return %arg1, %c0_i32 : i32, i32
  }
  func.func @transform_2(%arg0: i32, %arg1: i32) -> (i32, i32) {
    %c0_i32 = arith.constant 0 : i32
    return %arg0, %arg1 : i32, i32
  }
  func.func @transform_3(%arg0: i32, %arg1: i32) -> (i32, i32) {
    %c0_i32 = arith.constant 0 : i32
    %c0_i32_0 = arith.constant 0 : i32
    return %arg0, %c0_i32 : i32, i32
  }
}

</mosaic_0001>

<bundles_post_ra>
// kernel: tpu_custom_call.1
= control target key start
LH: loop header
LB: loop body
LE: loop exit
PB: predicated region body
PF: predicated region fallthrough
CT: control target
= control target key end

     0   :  { %8 = vsyncpa [#allocation4], 0  ;;  %s2035_s0 = inlined_call_operand.hbm [shape: f32[256,128], index: 0, kind: input, shape index: {}]   ;;  %s2036_s1 = inlined_call_operand.hbm [shape: f32[256,128], index: 1, kind: input, shape index: {}]   ;;  %s2037_s2 = inlined_call_operand.hbm [shape: s8[256,256], index: 2, kind: input, shape index: {}]   ;;  %s2038_s3 = inlined_call_operand.hbm [shape: f32[256,128], index: 3, kind: output, shape index: {}]  }
   0x1   :  { %9 = vsyncpa [#allocation7], 0 }
   0x2   :  { %10 = vsyncpa [#allocation5], 0  ;;  %s28_s14 = sshll.u32 %s2036_s1, 4  ;;  %s1785_s15 = smov [#allocation6]   ;;  %s29_s14 = int_to_ptr.hbm [resolvable:$true] %s28_s14 }
   0x3   :  { %s30_s16 = sshll.u32 %s1785_s15, 4  ;;  %s15_s19 = sshll.u32 %s2035_s0, 4  ;;  %s31_s16 = int_to_ptr.vmem [resolvable:$true] %s30_s16  ;;  %s16_s19 = int_to_ptr.hbm [resolvable:$true] %s15_s19 }
   0x4   :  { %s1786_s20 = smov 128   ;;  %s1787_s21 = smov 8  }
   0x5   :  { %36 = dma.hbm_to_vmem [thread:$0]  %s29_s14, 4096, %s31_s16, [#allocation7], %s1786_s20, %s1786_s20, %s1787_s21  }
   0x6   :  { %s1788_s22 = smov [#allocation3]   ;;  %s41_s1 = sshll.u32 %s2037_s2, 4  ;;  %s42_s1 = int_to_ptr.hbm [resolvable:$true] %s41_s1 }
   0x7   :  { %s17_s23 = sshll.u32 %s1788_s22, 4  ;;  %s1789_s0 = smov [#allocation8]   ;;  %s18_s23 = int_to_ptr.vmem [resolvable:$true] %s17_s23 }
   0x8   :  { %23 = dma.hbm_to_vmem [thread:$0]  %s16_s19, 4096, %s18_s23, [#allocation4], %s1786_s20, %s1786_s20, %s1787_s21  }
   0x9   :  { %s43_s26 = sshll.u32 %s1789_s0, 4  ;;  %s1790_s27 = smov 256   ;;  %s44_s26 = int_to_ptr.vmem [resolvable:$true] %s43_s26 }
   0xa   :  { %s1791_s28 = smov 16  }
   0xb   :  { %49 = dma.hbm_to_vmem [thread:$0]  %s42_s1, 2048, %s44_s26, [#allocation7], %s1790_s27, %s1790_s27, %s1791_s28  }
   0xc   :  { %1779 = dma.done.wait [#allocation4], 4096  }
   0xd   :  { %1780 = vsyncadd [#allocation4], 4294963200 }
   0xe   :  { %1781 = dma.done.wait [#allocation7], 6144  }
   0xf   :  { %1782 = vsyncadd [#allocation7], 4294961152  ;;  %v145_v0 = vld [vmem:[#allocation6 + $0x78] sm:$0xff]  ;;  %v144_v2 = vld [vmem:[#allocation6 + $0x70] sm:$0xff]  ;;  %s1792_s2 = smov [#allocation9]   ;;  %s1501_s5 = sshll.u32 %s2038_s3, 4  ;;  %s1502_s5 = int_to_ptr.hbm [resolvable:$true] %s1501_s5 }
  0x10   :  { %v161_v1 = vld [vmem:[#allocation6 + $0xf8] sm:$0xff]  ;;  %1515 = vmatpush.xpose.msra.mxu2 %v145_v0  ;;  %162 = vmatpush.xpose.msra.mxu0 %v145_v0  ;;  %v160_v3 = vld [vmem:[#allocation6 + $0xf0] sm:$0xff]  ;;  %v143_v4 = vld [vmem:[#allocation6 + $0x68] sm:$0xff]  ;;  %s1499_s29 = sshll.u32 %s1792_s2, 4  ;;  %s1500_s29 = int_to_ptr.vmem [resolvable:$true] %s1499_s29 }
  0x11   :  { %1531 = vmatpush.xpose.msra.mxu3 %v161_v1  ;;  %275 = vmatpush.xpose.msra.mxu1 %v161_v1  ;;  %v159_v5 = vld [vmem:[#allocation6 + $0xe8] sm:$0xff]  ;;  %v142_v6 = vld [vmem:[#allocation6 + $0x60] sm:$0xff]  ;;  %v141_v8 = vld [vmem:[#allocation6 + $0x58] sm:$0xff] }
  0x12   :  { %v158_v7 = vld [vmem:[#allocation6 + $0xe0] sm:$0xff]  ;;  %v157_v9 = vld [vmem:[#allocation6 + $0xd8] sm:$0xff]  ;;  %v140_v10 = vld [vmem:[#allocation6 + $0x50] sm:$0xff] }
  0x13   :  { %v156_v11 = vld [vmem:[#allocation6 + $0xd0] sm:$0xff]  ;;  %v139_v12 = vld [vmem:[#allocation6 + $0x48] sm:$0xff]  ;;  %v138_v14 = vld [vmem:[#allocation6 + $0x40] sm:$0xff] }
  0x14   :  { %1516 = vmatpush.xpose.msra.mxu2 %v144_v2  ;;  %163 = vmatpush.xpose.msra.mxu0 %v144_v2  ;;  %v155_v13 = vld [vmem:[#allocation6 + $0xc8] sm:$0xff]  ;;  %v154_v15 = vld [vmem:[#allocation6 + $0xc0] sm:$0xff]  ;;  %v137_v16 = vld [vmem:[#allocation6 + $0x38] sm:$0xff] }
  0x15   :  { %1532 = vmatpush.xpose.msra.mxu3 %v160_v3  ;;  %276 = vmatpush.xpose.msra.mxu1 %v160_v3  ;;  %v153_v17 = vld [vmem:[#allocation6 + $0xb8] sm:$0xff]  ;;  %v136_v18 = vld [vmem:[#allocation6 + $0x30] sm:$0xff]  ;;  %v135_v20 = vld [vmem:[#allocation6 + $0x28] sm:$0xff] }
  0x16   :  { %v152_v19 = vld [vmem:[#allocation6 + $0xb0] sm:$0xff]  ;;  %v151_v21 = vld [vmem:[#allocation6 + $0xa8] sm:$0xff]  ;;  %v134_v22 = vld [vmem:[#allocation6 + $0x20] sm:$0xff] }
  0x17   :  { %v150_v23 = vld [vmem:[#allocation6 + $0xa0] sm:$0xff]  ;;  %v133_v24 = vld [vmem:[#allocation6 + $0x18] sm:$0xff]  ;;  %v132_v26 = vld [vmem:[#allocation6 + $0x10] sm:$0xff] }
  0x18   :  { %1517 = vmatpush.xpose.msra.mxu2 %v143_v4  ;;  %164 = vmatpush.xpose.msra.mxu0 %v143_v4  ;;  %v149_v25 = vld [vmem:[#allocation6 + $0x98] sm:$0xff]  ;;  %v148_v27 = vld [vmem:[#allocation6 + $0x90] sm:$0xff]  ;;  %v131_v28 = vld [vmem:[#allocation6 + $0x8] sm:$0xff] }
  0x19   :  { %1533 = vmatpush.xpose.msra.mxu3 %v159_v5  ;;  %277 = vmatpush.xpose.msra.mxu1 %v159_v5  ;;  %v147_v29 = vld [vmem:[#allocation6 + $0x88] sm:$0xff]  ;;  %v130_v30 = vld [vmem:[#allocation6] sm:$0xff]  ;;  %v116_v36 = vld [vmem:[#allocation3 + $0x90] sm:$0xff] }
  0x1a   :  { %v146_v31 = vld [vmem:[#allocation6 + $0x80] sm:$0xff]  ;;  %v115_v34 = vld [vmem:[#allocation3 + $0x88] sm:$0xff]  ;;  %v100_v37 = vld [vmem:[#allocation3 + $0x10] sm:$0xff] }
  0x1b   :  { %v114_v32 = vld [vmem:[#allocation3 + $0x80] sm:$0xff]  ;;  %v99_v35 = vld [vmem:[#allocation3 + $0x8] sm:$0xff]  ;;  %v117_v38 = vld [vmem:[#allocation3 + $0x98] sm:$0xff] }
  0x1c   :  { %1518 = vmatpush.xpose.msra.mxu2 %v142_v6  ;;  %165 = vmatpush.xpose.msra.mxu0 %v142_v6  ;;  %v98_v33 = vld [vmem:[#allocation3] sm:$0xff]  ;;  %v101_v39 = vld [vmem:[#allocation3 + $0x18] sm:$0xff]  ;;  %v119_v42 = vld [vmem:[#allocation3 + $0xa8] sm:$0xff] }
  0x1d   :  { %1534 = vmatpush.xpose.msra.mxu3 %v158_v7  ;;  %278 = vmatpush.xpose.msra.mxu1 %v158_v7  ;;  %v118_v40 = vld [vmem:[#allocation3 + $0xa0] sm:$0xff]  ;;  %v103_v43 = vld [vmem:[#allocation3 + $0x28] sm:$0xff]  ;;  %v120_v44 = vld [vmem:[#allocation3 + $0xb0] sm:$0xff] }
  0x1e   :  { %v102_v41 = vld [vmem:[#allocation3 + $0x20] sm:$0xff]  ;;  %v104_v45 = vld [vmem:[#allocation3 + $0x30] sm:$0xff]  ;;  %v121_v46 = vld [vmem:[#allocation3 + $0xb8] sm:$0xff] }
  0x1f   :  { %v105_v47 = vld [vmem:[#allocation3 + $0x38] sm:$0xff]  ;;  %v122_v48 = vld [vmem:[#allocation3 + $0xc0] sm:$0xff]  ;;  %v123_v50 = vld [vmem:[#allocation3 + $0xc8] sm:$0xff] }
  0x20   :  { %1519 = vmatpush.xpose.msra.mxu2 %v141_v8  ;;  %166 = vmatpush.xpose.msra.mxu0 %v141_v8  ;;  %v106_v49 = vld [vmem:[#allocation3 + $0x40] sm:$0xff]  ;;  %v107_v51 = vld [vmem:[#allocation3 + $0x48] sm:$0xff]  ;;  %v124_v52 = vld [vmem:[#allocation3 + $0xd0] sm:$0xff] }
  0x21   :  { %1535 = vmatpush.xpose.msra.mxu3 %v157_v9  ;;  %279 = vmatpush.xpose.msra.mxu1 %v157_v9  ;;  %v108_v53 = vld [vmem:[#allocation3 + $0x50] sm:$0xff]  ;;  %v125_v54 = vld [vmem:[#allocation3 + $0xd8] sm:$0xff]  ;;  %v126_v56 = vld [vmem:[#allocation3 + $0xe0] sm:$0xff] }
  0x22   :  { %v109_v55 = vld [vmem:[#allocation3 + $0x58] sm:$0xff]  ;;  %v110_v57 = vld [vmem:[#allocation3 + $0x60] sm:$0xff]  ;;  %v1830_v59 = vld [vmem:[#allocation8 + $0x8] sm:$0xff] }
  0x23   :  { %v1828_v58 = vld [vmem:[#allocation8] sm:$0xff]  ;;  %v127_v60 = vld [vmem:[#allocation3 + $0xe8] sm:$0xff]  ;;  %v661_v63 = vunpack.c.0.s8 %v1830_v59  ;;  %v128_v8 = vld [vmem:[#allocation3 + $0xf0] sm:$0xff] }
  0x24   :  { %1520 = vmatpush.xpose.msra.mxu2 %v140_v10  ;;  %167 = vmatpush.xpose.msra.mxu0 %v140_v10  ;;  %v660_v61 = vunpack.c.0.s8 %v1828_v58  ;;  %v111_v62 = vld [vmem:[#allocation3 + $0x68] sm:$0xff]  ;;  %v1834_v0 = vld [vmem:[#allocation8 + $0x40] sm:$0xff] }
  0x25   :  { %1536 = vmatpush.xpose.msra.mxu3 %v156_v11  ;;  %280 = vmatpush.xpose.msra.mxu1 %v156_v11  ;;  %v1836_v3 = vld [vmem:[#allocation8 + $0x48] sm:$0xff]  ;;  %v725_v4 = vshra.s32 %v661_v63, 1  ;;  %v692_v5 = vunpack.c.0.s8 %v1834_v0  ;;  %v853_v6 = vand.u32 1, %v661_v63  ;;  %v696_v63 = vunpack.c.2.s8 %v1834_v0 }
  0x26   :  { %v724_v1 = vshra.s32 %v660_v61, 1  ;;  %v852_v2 = vand.u32 1, %v660_v61  ;;  %v693_v7 = vunpack.c.0.s8 %v1836_v3 }
  0x27   :  { %v756_v11 = vshra.s32 %v692_v5, 1 }
  0x28   :  { %1521 = vmatpush.xpose.msra.mxu2 %v139_v12  ;;  %168 = vmatpush.xpose.msra.mxu0 %v139_v12  ;;  %v788_v9 = vcvt.s32.f32 %v724_v1  ;;  %v916_v10 = vcvt.s32.f32 %v852_v2  ;;  %v112_v12 = vld [vmem:[#allocation3 + $0x70] sm:$0xff] }
  0x29   :  { %1537 = vmatpush.xpose.msra.mxu3 %v155_v13  ;;  %281 = vmatpush.xpose.msra.mxu1 %v155_v13  ;;  %v789_v13 = vcvt.s32.f32 %v725_v4 }
  0x2c   :  { %1522 = vmatpush.xpose.msra.mxu2 %v138_v14  ;;  %169 = vmatpush.xpose.msra.mxu0 %v138_v14  ;;  %v884_v14 = vand.u32 1, %v692_v5  ;;  %v697_v5 = vunpack.c.2.s8 %v1836_v3 }
  0x2d   :  { %1538 = vmatpush.xpose.msra.mxu3 %v154_v15  ;;  %282 = vmatpush.xpose.msra.mxu1 %v154_v15  ;;  %v662_v15 = vunpack.c.1.s8 %v1828_v58 }
  0x30   :  { %1523 = vmatpush.xpose.msra.mxu2 %v137_v16  ;;  %170 = vmatpush.xpose.msra.mxu0 %v137_v16  ;;  %v917_v16 = vcvt.s32.f32 %v853_v6 }
  0x31   :  { %1539 = vmatpush.xpose.msra.mxu3 %v153_v17  ;;  %283 = vmatpush.xpose.msra.mxu1 %v153_v17  ;;  %v757_v17 = vshra.s32 %v693_v7, 1 }
  0x34   :  { %1524 = vmatpush.xpose.msra.mxu2 %v136_v18  ;;  %171 = vmatpush.xpose.msra.mxu0 %v136_v18  ;;  %v885_v18 = vand.u32 1, %v693_v7 }
  0x35   :  { %1540 = vmatpush.xpose.msra.mxu3 %v152_v19  ;;  %284 = vmatpush.xpose.msra.mxu1 %v152_v19  ;;  %v663_v19 = vunpack.c.1.s8 %v1830_v59 }
  0x38   :  { %1525 = vmatpush.xpose.msra.mxu2 %v135_v20  ;;  %172 = vmatpush.xpose.msra.mxu0 %v135_v20  ;;  %v1842_v20 = vadd.f32 %v916_v10, %v788_v9 }
  0x39   :  { %1541 = vmatpush.xpose.msra.mxu3 %v151_v21  ;;  %285 = vmatpush.xpose.msra.mxu1 %v151_v21  ;;  %v820_v21 = vcvt.s32.f32 %v756_v11 }
  0x3c   :  { %1526 = vmatpush.xpose.msra.mxu2 %v134_v22  ;;  %173 = vmatpush.xpose.msra.mxu0 %v134_v22  ;;  %v726_v22 = vshra.s32 %v662_v15, 1 }
  0x3d   :  { %1542 = vmatpush.xpose.msra.mxu3 %v150_v23  ;;  %286 = vmatpush.xpose.msra.mxu1 %v150_v23  ;;  %v854_v23 = vand.u32 1, %v662_v15 }
  0x40   :  { %1527 = vmatpush.xpose.msra.mxu2 %v133_v24  ;;  %174 = vmatpush.xpose.msra.mxu0 %v133_v24  ;;  %v948_v24 = vcvt.s32.f32 %v884_v14 }
  0x41   :  { %1543 = vmatpush.xpose.msra.mxu3 %v149_v25  ;;  %287 = vmatpush.xpose.msra.mxu1 %v149_v25  ;;  %v727_v25 = vshra.s32 %v663_v19, 1 }
  0x44   :  { %1528 = vmatpush.xpose.msra.mxu2 %v132_v26  ;;  %175 = vmatpush.xpose.msra.mxu0 %v132_v26  ;;  %v855_v26 = vand.u32 1, %v663_v19 }
  0x45   :  { %1544 = vmatpush.xpose.msra.mxu3 %v148_v27  ;;  %288 = vmatpush.xpose.msra.mxu1 %v148_v27  ;;  %v694_v27 = vunpack.c.1.s8 %v1834_v0 }
  0x48   :  { %1529 = vmatpush.xpose.msra.mxu2 %v131_v28  ;;  %176 = vmatpush.xpose.msra.mxu0 %v131_v28  ;;  %v1845_v28 = vadd.f32 %v917_v16, %v789_v13 }
  0x49   :  { %1545 = vmatpush.xpose.msra.mxu3 %v147_v29  ;;  %289 = vmatpush.xpose.msra.mxu1 %v147_v29  ;;  %v821_v29 = vcvt.s32.f32 %v757_v17 }
  0x4c   :  { %1530 = vmatpush.xpose.msra.mxu2 %v130_v30  ;;  %177 = vmatpush.xpose.msra.mxu0 %v130_v30  ;;  %v949_v30 = vcvt.s32.f32 %v885_v18 }
  0x4d   :  { %1546 = vmatpush.xpose.msra.mxu3 %v146_v31  ;;  %290 = vmatpush.xpose.msra.mxu1 %v146_v31  ;;  %v695_v31 = vunpack.c.1.s8 %v1836_v3 }
  0x4f   :  { %226 = vmatmul.f32.vlgmr.msra.gmra.mxu2 %v114_v32  ;;  %178 = vmatmul.f32.vlgmr.msra.gmra.mxu0 %v98_v33 }
  0x50   :  { %339 = vmatmul.f32.vlgmr.msra.gmra.mxu3 %v114_v32  ;;  %291 = vmatmul.f32.vlgmr.msra.gmra.mxu1 %v98_v33  ;;  %v1848_v32 = vmul.f32 2.0, %v788_v9  ;;  %v1850_v33 = vmul.f32 2.0, %v789_v13  ;;  %v888_v9 = vand.u32 1, %v696_v63  ;;  %v889_v13 = vand.u32 1, %v697_v5 }
  0x57   :  { %229 = vmatmul.f32.gmra.mxu2 %v115_v34  ;;  %181 = vmatmul.f32.gmra.mxu0 %v99_v35 }
  0x58   :  { %342 = vmatmul.f32.gmra.mxu3 %v115_v34  ;;  %294 = vmatmul.f32.gmra.mxu1 %v99_v35  ;;  %v758_v34 = vshra.s32 %v694_v27, 1  ;;  %v886_v35 = vand.u32 1, %v694_v27  ;;  %v666_v27 = vunpack.c.3.s8 %v1828_v58 }
  0x5f   :  { %232 = vmatmul.f32.gmra.mxu2 %v116_v36  ;;  %184 = vmatmul.f32.gmra.mxu0 %v100_v37 }
  0x60   :  { %345 = vmatmul.f32.gmra.mxu3 %v116_v36  ;;  %297 = vmatmul.f32.gmra.mxu1 %v100_v37  ;;  %v129_v36 = vld [vmem:[#allocation3 + $0xf8] sm:$0xff]  ;;  %v790_v37 = vcvt.s32.f32 %v726_v22 }
  0x67   :  { %235 = vmatmul.f32.gmra.mxu2 %v117_v38  ;;  %187 = vmatmul.f32.gmra.mxu0 %v101_v39 }
  0x68   :  { %348 = vmatmul.f32.gmra.mxu3 %v117_v38  ;;  %300 = vmatmul.f32.gmra.mxu1 %v101_v39  ;;  %v918_v38 = vcvt.s32.f32 %v854_v23  ;;  %v759_v39 = vshra.s32 %v695_v31, 1  ;;  %v952_v23 = vcvt.s32.f32 %v888_v9 }
  0x6f   :  { %238 = vmatmul.f32.gmra.mxu2 %v118_v40  ;;  %190 = vmatmul.f32.gmra.mxu0 %v102_v41 }
  0x70   :  { %351 = vmatmul.f32.gmra.mxu3 %v118_v40  ;;  %303 = vmatmul.f32.gmra.mxu1 %v102_v41  ;;  %v887_v40 = vand.u32 1, %v695_v31  ;;  %v113_v41 = vld [vmem:[#allocation3 + $0x78] sm:$0xff] }
  0x77   :  { %241 = vmatmul.f32.gmra.mxu2 %v119_v42  ;;  %193 = vmatmul.f32.gmra.mxu0 %v103_v43 }
  0x78   :  { %354 = vmatmul.f32.gmra.mxu3 %v119_v42  ;;  %306 = vmatmul.f32.gmra.mxu1 %v103_v43  ;;  %v1852_v42 = vadd.f32 %v948_v24, %v820_v21  ;;  %v1854_v43 = vmul.f32 2.0, %v820_v21 }
  0x7f   :  { %244 = vmatmul.f32.gmra.mxu2 %v120_v44  ;;  %196 = vmatmul.f32.gmra.mxu0 %v104_v45 }
  0x80   :  { %357 = vmatmul.f32.gmra.mxu3 %v120_v44  ;;  %309 = vmatmul.f32.gmra.mxu1 %v104_v45  ;;  %v791_v44 = vcvt.s32.f32 %v727_v25  ;;  %v919_v45 = vcvt.s32.f32 %v855_v26  ;;  %v953_v26 = vcvt.s32.f32 %v889_v13 }
  0x82   :  { %v1866_v61 = vadd.f32 %v919_v45, %v791_v44  ;;  %v1869_v1 = vmul.f32 2.0, %v791_v44 }
  0x87   :  { %247 = vmatmul.f32.gmra.mxu2 %v121_v46  ;;  %199 = vmatmul.f32.gmra.mxu0 %v105_v47 }
  0x88   :  { %360 = vmatmul.f32.gmra.mxu3 %v121_v46  ;;  %312 = vmatmul.f32.gmra.mxu1 %v105_v47  ;;  %v1856_v46 = vadd.f32 %v949_v30, %v821_v29  ;;  %v1858_v47 = vmul.f32 2.0, %v821_v29  ;;  %v667_v29 = vunpack.c.3.s8 %v1830_v59 }
  0x8f   :  { %250 = vmatmul.f32.gmra.mxu2 %v122_v48  ;;  %202 = vmatmul.f32.gmra.mxu0 %v106_v49 }
  0x90   :  { %363 = vmatmul.f32.gmra.mxu3 %v122_v48  ;;  %315 = vmatmul.f32.gmra.mxu1 %v106_v49  ;;  %v664_v48 = vunpack.c.2.s8 %v1828_v58  ;;  %v665_v49 = vunpack.c.2.s8 %v1830_v59  ;;  %v858_v58 = vand.u32 1, %v666_v27  ;;  %v859_v59 = vand.u32 1, %v667_v29 }
  0x97   :  { %253 = vmatmul.f32.gmra.mxu2 %v123_v50  ;;  %205 = vmatmul.f32.gmra.mxu0 %v107_v51 }
  0x98   :  { %366 = vmatmul.f32.gmra.mxu3 %v123_v50  ;;  %318 = vmatmul.f32.gmra.mxu1 %v107_v51  ;;  %v822_v50 = vcvt.s32.f32 %v758_v34  ;;  %v950_v51 = vcvt.s32.f32 %v886_v35 }
  0x9a   :  { %v1872_v6 = vadd.f32 %v950_v51, %v822_v50  ;;  %v1876_v16 = vmul.f32 2.0, %v822_v50  ;;  %v922_v51 = vcvt.s32.f32 %v858_v58 }
  0x9f   :  { %256 = vmatmul.f32.gmra.mxu2 %v124_v52  ;;  %208 = vmatmul.f32.gmra.mxu0 %v108_v53 }
  0xa0   :  { %369 = vmatmul.f32.gmra.mxu3 %v124_v52  ;;  %321 = vmatmul.f32.gmra.mxu1 %v108_v53  ;;  %v823_v52 = vcvt.s32.f32 %v759_v39  ;;  %v951_v53 = vcvt.s32.f32 %v887_v40  ;;  %v730_v40 = vshra.s32 %v666_v27, 1 }
  0xa2   :  { %v1874_v7 = vadd.f32 %v951_v53, %v823_v52  ;;  %v1878_v17 = vmul.f32 2.0, %v823_v52  ;;  %v794_v50 = vcvt.s32.f32 %v730_v40  ;;  %v923_v53 = vcvt.s32.f32 %v859_v59 }
  0xa7   :  { %259 = vmatmul.f32.gmra.mxu2 %v125_v54  ;;  %211 = vmatmul.f32.gmra.mxu0 %v109_v55 }
  0xa8   :  { %372 = vmatmul.f32.gmra.mxu3 %v125_v54  ;;  %324 = vmatmul.f32.gmra.mxu1 %v109_v55  ;;  %v1862_v54 = vadd.f32 %v918_v38, %v790_v37  ;;  %v728_v55 = vshra.s32 %v664_v48, 1 }
  0xaa   :  { %v792_v2 = vcvt.s32.f32 %v728_v55 }
  0xac   :  { %v1882_v25 = vmul.f32 2.0, %v792_v2 }
  0xaf   :  { %262 = vmatmul.f32.gmra.mxu2 %v126_v56  ;;  %214 = vmatmul.f32.gmra.mxu0 %v110_v57 }
  0xb0   :  { %375 = vmatmul.f32.gmra.mxu3 %v126_v56  ;;  %327 = vmatmul.f32.gmra.mxu1 %v110_v57  ;;  %v856_v56 = vand.u32 1, %v664_v48  ;;  %v729_v57 = vshra.s32 %v665_v49, 1  ;;  %v698_v48 = vunpack.c.3.s8 %v1834_v0 }
  0xb2   :  { %v920_v4 = vcvt.s32.f32 %v856_v56  ;;  %v793_v10 = vcvt.s32.f32 %v729_v57  ;;  %v762_v57 = vshra.s32 %v698_v48, 1 }
  0xb4   :  { %v1880_v18 = vadd.f32 %v920_v4, %v792_v2  ;;  %v1888_v31 = vmul.f32 2.0, %v793_v10 }
  0xb7   :  { %265 = vmatmul.f32.gmra.mxu2 %v127_v60  ;;  %217 = vmatmul.f32.gmra.mxu0 %v111_v62 }
  0xb8   :  { %378 = vmatmul.f32.gmra.mxu3 %v127_v60  ;;  %330 = vmatmul.f32.gmra.mxu1 %v111_v62  ;;  %v1864_v60 = vmul.f32 2.0, %v790_v37  ;;  %v857_v62 = vand.u32 1, %v665_v49  ;;  %v699_v49 = vunpack.c.3.s8 %v1836_v3 }
  0xba   :  { %v921_v11 = vcvt.s32.f32 %v857_v62  ;;  %v890_v62 = vand.u32 1, %v698_v48 }
  0xbc   :  { %v1886_v30 = vadd.f32 %v921_v11, %v793_v10  ;;  %v1902_v10 = vmul.f32 2.0, %v794_v50 }
  0xbf   :  { %268 = vmatmul.f32.gmra.mxu2 %v128_v8  ;;  %220 = vmatmul.f32.gmra.mxu0 %v112_v12 }
  0xc0   :  { %381 = vmatmul.f32.gmra.mxu3 %v128_v8  ;;  %333 = vmatmul.f32.gmra.mxu1 %v112_v12  ;;  %v760_v8 = vshra.s32 %v696_v63, 1  ;;  %v761_v12 = vshra.s32 %v697_v5, 1  ;;  %v763_v63 = vshra.s32 %v699_v49, 1 }
  0xc2   :  { %v824_v19 = vcvt.s32.f32 %v760_v8  ;;  %v825_v24 = vcvt.s32.f32 %v761_v12  ;;  %v1900_v8 = vadd.f32 %v922_v51, %v794_v50  ;;  %v1908_v12 = vld [vmem:[#allocation8 + $0x10] sm:$0xff] }
  0xc4   :  { %v1890_v34 = vadd.f32 %v952_v23, %v824_v19  ;;  %v1892_v35 = vmul.f32 2.0, %v824_v19  ;;  %v1896_v37 = vmul.f32 2.0, %v825_v24 }
  0xc7   :  { %271 = vmatmul.f32.gmra.mxu2 %v129_v36  ;;  %223 = vmatmul.f32.gmra.mxu0 %v113_v41 }
  0xc8   :  { %384 = vmatmul.f32.gmra.mxu3 %v129_v36  ;;  %336 = vmatmul.f32.gmra.mxu1 %v113_v41  ;;  %v1894_v36 = vadd.f32 %v953_v26, %v825_v24  ;;  %v731_v41 = vshra.s32 %v667_v29, 1 }
  0xca   :  { %v795_v52 = vcvt.s32.f32 %v731_v41 }
  0xcc   :  { %v179_v14 = vpop.f32.mrf.mxu0  ;;  %v1904_v3 = vadd.f32 %v923_v53, %v795_v52  ;;  %v1906_v11 = vmul.f32 2.0, %v795_v52 }
  0xcd   :  { %v292_v15 = vpop.f32.mrf.mxu1  ;;  %v388_v21 = vmul.f32 0.5, %v179_v14  ;;  %v826_v14 = vcvt.s32.f32 %v762_v57 }
  0xce   :  { %v389_v22 = vmul.f32 0.5, %v292_v15  ;;  %v954_v15 = vcvt.s32.f32 %v890_v62 }
  0xcf   :  { %1555 = vtanh.f32 %v388_v21  ;;  %v827_v21 = vcvt.s32.f32 %v763_v63  ;;  %v1912_v29 = vmul.f32 2.0, %v826_v14 }
  0xd0   :  { %1557 = vtanh.f32 %v389_v22  ;;  %v891_v22 = vand.u32 1, %v699_v49  ;;  %v1910_v27 = vadd.f32 %v954_v15, %v826_v14 }
  0xd1   :  { %v1917_v49 = vmul.f32 2.0, %v827_v21 }
  0xd2   :  { %v227_v38 = vpop.f32.mrf.mxu2  ;;  %v955_v59 = vcvt.s32.f32 %v891_v22 }
  0xd3   :  { %v340_v39 = vpop.f32.mrf.mxu3  ;;  %v420_v44 = vmul.f32 0.5, %v227_v38  ;;  %v668_v38 = vunpack.c.0.s8 %v1908_v12 }
  0xd4   :  { %v421_v45 = vmul.f32 0.5, %v340_v39  ;;  %v182_v55 = vpop.f32.mrf.mxu0 }
  0xd5   :  { %1559 = vtanh.f32 %v420_v44  ;;  %v295_v56 = vpop.f32.mrf.mxu1  ;;  %v1556_v2 = vpop.eup %1555  ;;  %v390_v4 = vmul.f32 0.5, %v182_v55  ;;  %v1919_v50 = vshra.s32 %v668_v38, 1 }
  0xd6   :  { %1561 = vtanh.f32 %v421_v45  ;;  %v391_v5 = vmul.f32 0.5, %v295_v56  ;;  %v1558_v9 = vpop.eup %1557  ;;  %v516_v0 = vmul.f32 0.5, %v1556_v2  ;;  %v1922_v56 = vadd.f32 %v955_v59, %v827_v21 }
  0xd7   :  { %v517_v13 = vmul.f32 0.5, %v1558_v9  ;;  %1563 = vtanh.f32 %v390_v4  ;;  %v796_v21 = vcvt.s32.f32 %v1919_v50 }
  0xd8   :  { %v580_v19 = vadd.f32 0.5, %v516_v0  ;;  %1565 = vtanh.f32 %v391_v5 }
  0xd9   :  { %v581_v23 = vadd.f32 0.5, %v517_v13 }
  0xda   :  { %v230_v24 = vpop.f32.mrf.mxu2  ;;  %v1044_v40 = vmul.f32 %v1842_v20, %v580_v19 }
  0xdb   :  { %v343_v26 = vpop.f32.mrf.mxu3  ;;  %v1560_v39 = vpop.eup %1559  ;;  %v422_v58 = vmul.f32 0.5, %v230_v24  ;;  %v1045_v45 = vmul.f32 %v1845_v28, %v581_v23 }
  0xdc   :  { %v423_v41 = vmul.f32 0.5, %v343_v26  ;;  %v1562_v44 = vpop.eup %1561  ;;  %v548_v48 = vmul.f32 0.5, %v1560_v39  ;;  %v1172_v51 = vsub.f32 %v1044_v40, %v1848_v32  ;;  %v185_v53 = vpop.f32.mrf.mxu0  ;;  %v860_v39 = vand.u32 1, %v668_v38 }
  0xdd   :  { %v549_v52 = vmul.f32 0.5, %v1562_v44  ;;  %1567 = vtanh.f32 %v422_v58  ;;  %v298_v55 = vpop.f32.mrf.mxu1  ;;  %v1564_v20 = vpop.eup %1563  ;;  %v1173_v57 = vsub.f32 %v1045_v45, %v1850_v33  ;;  %v392_v63 = vmul.f32 0.5, %v185_v53 }
  0xde   :  { %v612_v62 = vadd.f32 0.5, %v548_v48  ;;  %1569 = vtanh.f32 %v423_v41  ;;  %v1566_v28 = vpop.eup %1565  ;;  %v1236_v2 = vmul.f32 %v1172_v51, %v580_v19  ;;  %v518_v5 = vmul.f32 0.5, %v1564_v20 }
  0xdf   :  { %v613_v4 = vadd.f32 0.5, %v549_v52  ;;  %v393_v9 = vmul.f32 0.5, %v298_v55  ;;  %v1237_v0 = vmul.f32 %v1173_v57, %v581_v23  ;;  %v519_v13 = vmul.f32 0.5, %v1566_v28 }
  0xe0   :  { %v1076_v32 = vmul.f32 %v1852_v42, %v612_v62  ;;  %1571 = vtanh.f32 %v392_v63  ;;  %v582_v15 = vadd.f32 0.5, %v518_v5  ;;  %v924_v48 = vcvt.s32.f32 %v860_v39 }
  0xe1   :  { %v1077_v14 = vmul.f32 %v1856_v46, %v613_v4  ;;  %1573 = vtanh.f32 %v393_v9  ;;  %v1300_v33 = vadd.f32 %v1237_v0, %v1236_v2  ;;  %v583_v24 = vadd.f32 0.5, %v519_v13 }
  0xe2   :  { %v1204_v22 = vsub.f32 %v1076_v32, %v1854_v43  ;;  %v233_v26 = vpop.f32.mrf.mxu2  ;;  %v1046_v42 = vmul.f32 %v1862_v54, %v582_v15  ;;  %v1936_v0 = vadd.f32 %v924_v48, %v796_v21 }
  0xe3   :  { %v346_v19 = vpop.f32.mrf.mxu3  ;;  %v1568_v40 = vpop.eup %1567  ;;  %v1205_v23 = vsub.f32 %v1077_v14, %v1858_v47  ;;  %v424_v58 = vmul.f32 0.5, %v233_v26  ;;  %1463 = vst [vmem:[#allocation9] sm:$0xff] %v1300_v33  ;;  %v1047_v44 = vmul.f32 %v1866_v61, %v583_v24  ;;  %v1939_v33 = vmul.f32 2.0, %v796_v21 }
  0xe4   :  { %v425_v41 = vmul.f32 0.5, %v346_v19  ;;  %v1570_v59 = vpop.eup %1569  ;;  %v1268_v46 = vmul.f32 %v1204_v22, %v612_v62  ;;  %v550_v45 = vmul.f32 0.5, %v1568_v40  ;;  %v1174_v43 = vsub.f32 %v1046_v42, %v1864_v60  ;;  %v188_v38 = vpop.f32.mrf.mxu0 }
  0xe5   :  { %v1269_v50 = vmul.f32 %v1205_v23, %v613_v4  ;;  %v551_v51 = vmul.f32 0.5, %v1570_v59  ;;  %1575 = vtanh.f32 %v424_v58  ;;  %v301_v52 = vpop.f32.mrf.mxu1  ;;  %v1175_v47 = vsub.f32 %v1047_v44, %v1869_v1  ;;  %v1946_v44 = vld [vmem:[#allocation8 + $0x18] sm:$0xff] }
  0xe6   :  { %v1572_v53 = vpop.eup %1571  ;;  %v614_v54 = vadd.f32 0.5, %v550_v45  ;;  %1577 = vtanh.f32 %v425_v41  ;;  %v394_v55 = vmul.f32 0.5, %v188_v38  ;;  %v1238_v62 = vmul.f32 %v1174_v43, %v582_v15  ;;  %v1948_v45 = vld [vmem:[#allocation8 + $0x50] sm:$0xff] }
  0xe7   :  { %v1574_v20 = vpop.eup %1573  ;;  %v1316_v57 = vadd.f32 %v1269_v50, %v1268_v46  ;;  %v615_v63 = vadd.f32 0.5, %v551_v51  ;;  %v520_v61 = vmul.f32 0.5, %v1572_v53  ;;  %v1239_v28 = vmul.f32 %v1175_v47, %v583_v24 }
  0xe8   :  { %v1078_v2 = vmul.f32 %v1872_v6, %v614_v54  ;;  %v521_v4 = vmul.f32 0.5, %v1574_v20  ;;  %1579 = vtanh.f32 %v394_v55  ;;  %v395_v9 = vmul.f32 0.5, %v301_v52 }
  0xe9   :  { %1479 = vst [vmem:[#allocation9 + $0x80] sm:$0xff] %v1316_v57  ;;  %v1079_v60 = vmul.f32 %v1874_v7, %v615_v63  ;;  %v584_v5 = vadd.f32 0.5, %v520_v61  ;;  %v1301_v1 = vadd.f32 %v1239_v28, %v1238_v62  ;;  %v669_v47 = vunpack.c.0.s8 %v1946_v44 }
  0xea   :  { %v1206_v32 = vsub.f32 %v1078_v2, %v1876_v16  ;;  %v585_v13 = vadd.f32 0.5, %v521_v4  ;;  %v236_v14 = vpop.f32.mrf.mxu2  ;;  %1581 = vtanh.f32 %v395_v9 }
  0xeb   :  { %v349_v15 = vpop.f32.mrf.mxu3  ;;  %v1576_v22 = vpop.eup %1575  ;;  %v1207_v6 = vsub.f32 %v1079_v60, %v1878_v17  ;;  %v1048_v24 = vmul.f32 %v1880_v18, %v584_v5  ;;  %v426_v26 = vmul.f32 0.5, %v236_v14  ;;  %1464 = vst [vmem:[#allocation9 + $0x8] sm:$0xff] %v1301_v1  ;;  %v733_v28 = vshra.s32 %v669_v47, 1 }
  0xec   :  { %v1578_v7 = vpop.eup %1577  ;;  %v1270_v19 = vmul.f32 %v1206_v32, %v614_v54  ;;  %v1049_v39 = vmul.f32 %v1886_v30, %v585_v13  ;;  %v552_v40 = vmul.f32 0.5, %v1576_v22  ;;  %v427_v23 = vmul.f32 0.5, %v349_v15  ;;  %v191_v21 = vpop.f32.mrf.mxu0 }
  0xed   :  { %v1271_v16 = vmul.f32 %v1207_v6, %v615_v63  ;;  %v1176_v42 = vsub.f32 %v1048_v24, %v1882_v25  ;;  %v553_v58 = vmul.f32 0.5, %v1578_v7  ;;  %1583 = vtanh.f32 %v426_v26  ;;  %v304_v41 = vpop.f32.mrf.mxu1 }
  0xee   :  { %v1580_v59 = vpop.eup %1579  ;;  %v1177_v17 = vsub.f32 %v1049_v39, %v1888_v31  ;;  %v616_v18 = vadd.f32 0.5, %v552_v40  ;;  %1585 = vtanh.f32 %v427_v23  ;;  %v396_v46 = vmul.f32 0.5, %v191_v21 }
  0xef   :  { %v1317_v30 = vadd.f32 %v1271_v16, %v1270_v19  ;;  %v1240_v48 = vmul.f32 %v1176_v42, %v584_v5  ;;  %v617_v50 = vadd.f32 0.5, %v553_v58  ;;  %v522_v43 = vmul.f32 0.5, %v1580_v59 }
  0xf0   :  { %v1241_v51 = vmul.f32 %v1177_v17, %v585_v13  ;;  %v1080_v25 = vmul.f32 %v1890_v34, %v616_v18  ;;  %1587 = vtanh.f32 %v396_v46  ;;  %v397_v38 = vmul.f32 0.5, %v304_v41  ;;  %v1582_v52 = vpop.eup %1581 }
  0xf1   :  { %1480 = vst [vmem:[#allocation9 + $0x88] sm:$0xff] %v1317_v30  ;;  %v1081_v31 = vmul.f32 %v1894_v36, %v617_v50  ;;  %v586_v53 = vadd.f32 0.5, %v522_v43  ;;  %v700_v54 = vunpack.c.0.s8 %v1948_v45  ;;  %v523_v57 = vmul.f32 0.5, %v1582_v52 }
  0xf2   :  { %v1302_v55 = vadd.f32 %v1241_v51, %v1240_v48  ;;  %v1208_v20 = vsub.f32 %v1080_v25, %v1892_v35  ;;  %1589 = vtanh.f32 %v397_v38  ;;  %v239_v62 = vpop.f32.mrf.mxu2  ;;  %v861_v2 = vand.u32 1, %v669_v47 }
  0xf3   :  { %v1584_v63 = vpop.eup %1583  ;;  %v1209_v34 = vsub.f32 %v1081_v31, %v1896_v37  ;;  %v1050_v61 = vmul.f32 %v1900_v8, %v586_v53  ;;  %v587_v60 = vadd.f32 0.5, %v523_v57  ;;  %v428_v9 = vmul.f32 0.5, %v239_v62  ;;  %v352_v7 = vpop.f32.mrf.mxu3 }
  0xf4   :  { %v1586_v4 = vpop.eup %1585  ;;  %1465 = vst [vmem:[#allocation9 + $0x10] sm:$0xff] %v1302_v55  ;;  %v1272_v36 = vmul.f32 %v1208_v20, %v616_v18  ;;  %v554_v5 = vmul.f32 0.5, %v1584_v63  ;;  %v797_v13 = vcvt.s32.f32 %v733_v28  ;;  %v925_v37 = vcvt.s32.f32 %v861_v2  ;;  %v194_v48 = vpop.f32.mrf.mxu0 }
  0xf5   :  { %v1273_v1 = vmul.f32 %v1209_v34, %v617_v50  ;;  %v1178_v32 = vsub.f32 %v1050_v61, %v1902_v10  ;;  %v555_v35 = vmul.f32 0.5, %v1586_v4  ;;  %v1051_v15 = vmul.f32 %v1904_v3, %v587_v60  ;;  %v307_v47 = vpop.f32.mrf.mxu1 }
  0xf6   :  { %v1588_v14 = vpop.eup %1587  ;;  %v618_v22 = vadd.f32 0.5, %v554_v5  ;;  %1591 = vtanh.f32 %v428_v9  ;;  %v989_v23 = vadd.f32 %v925_v37, %v797_v13  ;;  %v1117_v10 = vmul.f32 2.0, %v797_v13 }
  0xf7   :  { %v1318_v8 = vadd.f32 %v1273_v1, %v1272_v36  ;;  %v1242_v6 = vmul.f32 %v1178_v32, %v586_v53  ;;  %v619_v24 = vadd.f32 0.5, %v555_v35  ;;  %v524_v26 = vmul.f32 0.5, %v1588_v14 }
  0xf8   :  { %v1590_v19 = vpop.eup %1589  ;;  %v1179_v39 = vsub.f32 %v1051_v15, %v1906_v11  ;;  %v1082_v40 = vmul.f32 %v1910_v27, %v618_v22  ;;  %v764_v58 = vshra.s32 %v700_v54, 1  ;;  %v892_v59 = vand.u32 1, %v700_v54  ;;  %v1965_v27 = vld [vmem:[#allocation8 + $0x58] sm:$0xff] }
  0xf9   :  { %1481 = vst [vmem:[#allocation9 + $0x90] sm:$0xff] %v1318_v8  ;;  %v1083_v16 = vmul.f32 %v1922_v56, %v619_v24  ;;  %v588_v42 = vadd.f32 0.5, %v524_v26  ;;  %v525_v3 = vmul.f32 0.5, %v1590_v19  ;;  %v429_v17 = vmul.f32 0.5, %v352_v7 }
  0xfa   :  { %v1243_v21 = vmul.f32 %v1179_v39, %v587_v60  ;;  %v1210_v41 = vsub.f32 %v1082_v40, %v1912_v29  ;;  %v828_v30 = vcvt.s32.f32 %v764_v58  ;;  %v956_v51 = vcvt.s32.f32 %v892_v59  ;;  %v242_v13 = vpop.f32.mrf.mxu2 }
  0xfb   :  { %v1211_v18 = vsub.f32 %v1083_v16, %v1917_v49  ;;  %v1052_v46 = vmul.f32 %v1936_v0, %v588_v42  ;;  %v589_v11 = vadd.f32 0.5, %v525_v3  ;;  %1593 = vtanh.f32 %v429_v17  ;;  %v355_v7 = vpop.f32.mrf.mxu3 }
  0xfc   :  { %v1592_v50 = vpop.eup %1591  ;;  %v1303_v43 = vadd.f32 %v1243_v21, %v1242_v6  ;;  %v1274_v56 = vmul.f32 %v1210_v41, %v618_v22  ;;  %v1020_v31 = vadd.f32 %v956_v51, %v828_v30  ;;  %v1148_v49 = vmul.f32 2.0, %v828_v30  ;;  %v197_v17 = vpop.f32.mrf.mxu0 }
  0xfd   :  { %v1275_v25 = vmul.f32 %v1211_v18, %v619_v24  ;;  %v1180_v38 = vsub.f32 %v1052_v46, %v1939_v33  ;;  %v1053_v29 = vmul.f32 %v989_v23, %v589_v11  ;;  %v556_v52 = vmul.f32 0.5, %v1592_v50 }
  0xfe   :  { %1466 = vst [vmem:[#allocation9 + $0x18] sm:$0xff] %v1303_v43  ;;  %v701_v0 = vunpack.c.0.s8 %v1965_v27  ;;  %v398_v53 = vmul.f32 0.5, %v194_v48  ;;  %v670_v34 = vunpack.c.1.s8 %v1908_v12  ;;  %v399_v28 = vmul.f32 0.5, %v307_v47 }
  0xff   :  { %v1319_v54 = vadd.f32 %v1275_v25, %v1274_v56  ;;  %v1244_v55 = vmul.f32 %v1180_v38, %v588_v42  ;;  %v1181_v20 = vsub.f32 %v1053_v29, %v1117_v10  ;;  %v620_v57 = vadd.f32 0.5, %v556_v52 }
 0x100   :  { %v765_v62 = vshra.s32 %v701_v0, 1  ;;  %v893_v63 = vand.u32 1, %v701_v0  ;;  %1595 = vtanh.f32 %v398_v53  ;;  %v671_v2 = vunpack.c.1.s8 %v1946_v44 }
 0x101   :  { %1482 = vst [vmem:[#allocation9 + $0x98] sm:$0xff] %v1319_v54  ;;  %v1245_v33 = vmul.f32 %v1181_v20, %v589_v11  ;;  %v1084_v61 = vmul.f32 %v1020_v31, %v620_v57  ;;  %v1594_v4 = vpop.eup %1593  ;;  %v734_v5 = vshra.s32 %v670_v34, 1  ;;  %v862_v9 = vand.u32 1, %v670_v34  ;;  %v310_v20 = vpop.f32.mrf.mxu1 }
 0x102   :  { %v829_v36 = vcvt.s32.f32 %v765_v62  ;;  %v957_v60 = vcvt.s32.f32 %v893_v63  ;;  %v557_v35 = vmul.f32 0.5, %v1594_v4  ;;  %1597 = vtanh.f32 %v399_v28 }
 0x103   :  { %v1304_v1 = vadd.f32 %v1245_v33, %v1244_v55  ;;  %v1212_v32 = vsub.f32 %v1084_v61, %v1148_v49  ;;  %v798_v22 = vcvt.s32.f32 %v734_v5  ;;  %v926_v37 = vcvt.s32.f32 %v862_v9 }
 0x104   :  { %v1021_v14 = vadd.f32 %v957_v60, %v829_v36  ;;  %v1149_v15 = vmul.f32 2.0, %v829_v36  ;;  %v621_v6 = vadd.f32 0.5, %v557_v35  ;;  %v735_v24 = vshra.s32 %v671_v2, 1 }
 0x105   :  { %1467 = vst [vmem:[#allocation9 + $0x20] sm:$0xff] %v1304_v1  ;;  %v1276_v8 = vmul.f32 %v1212_v32, %v620_v57  ;;  %v863_v26 = vand.u32 1, %v671_v2  ;;  %v990_v39 = vadd.f32 %v926_v37, %v798_v22  ;;  %v1118_v40 = vmul.f32 2.0, %v798_v22  ;;  %v245_v1 = vpop.f32.mrf.mxu2 }
 0x106   :  { %v1596_v19 = vpop.eup %1595  ;;  %v430_v23 = vmul.f32 0.5, %v242_v13  ;;  %v702_v10 = vunpack.c.1.s8 %v1948_v45  ;;  %v1085_v16 = vmul.f32 %v1021_v14, %v621_v6  ;;  %v799_v3 = vcvt.s32.f32 %v735_v24 }
 0x107   :  { %v526_v42 = vmul.f32 0.5, %v1596_v19  ;;  %v927_v58 = vcvt.s32.f32 %v863_v26  ;;  %v431_v59 = vmul.f32 0.5, %v355_v7  ;;  %v703_v38 = vunpack.c.1.s8 %v1965_v27 }
 0x108   :  { %1599 = vtanh.f32 %v430_v23  ;;  %v766_v21 = vshra.s32 %v702_v10, 1  ;;  %v894_v41 = vand.u32 1, %v702_v10  ;;  %v1598_v18 = vpop.eup %1597  ;;  %v1213_v46 = vsub.f32 %v1085_v16, %v1149_v15  ;;  %v358_v15 = vpop.f32.mrf.mxu3 }
 0x109   :  { %v590_v11 = vadd.f32 0.5, %v526_v42  ;;  %v991_v30 = vadd.f32 %v927_v58, %v799_v3  ;;  %v1119_v48 = vmul.f32 2.0, %v799_v3  ;;  %v527_v50 = vmul.f32 0.5, %v1598_v18 }
 0x10a   :  { %v830_v43 = vcvt.s32.f32 %v766_v21  ;;  %v958_v56 = vcvt.s32.f32 %v894_v41  ;;  %1601 = vtanh.f32 %v431_v59  ;;  %v1277_v51 = vmul.f32 %v1213_v46, %v621_v6 }
 0x10b   :  { %v1054_v25 = vmul.f32 %v990_v39, %v590_v11  ;;  %v400_v29 = vmul.f32 0.5, %v197_v17  ;;  %v591_v52 = vadd.f32 0.5, %v527_v50  ;;  %v672_v0 = vunpack.c.2.s8 %v1908_v12 }
 0x10c   :  { %v1022_v31 = vadd.f32 %v958_v56, %v830_v43  ;;  %v1150_v49 = vmul.f32 2.0, %v830_v43  ;;  %v1320_v53 = vadd.f32 %v1277_v51, %v1276_v8  ;;  %v767_v54 = vshra.s32 %v703_v38, 1 }
 0x10d   :  { %v1182_v47 = vsub.f32 %v1054_v25, %v1118_v40  ;;  %v895_v55 = vand.u32 1, %v703_v38  ;;  %v1055_v62 = vmul.f32 %v991_v30, %v591_v52  ;;  %1603 = vtanh.f32 %v400_v29  ;;  %v200_v29 = vpop.f32.mrf.mxu0 }
 0x10e   :  { %v1600_v57 = vpop.eup %1599  ;;  %v736_v63 = vshra.s32 %v672_v0, 1  ;;  %v864_v34 = vand.u32 1, %v672_v0  ;;  %1483 = vst [vmem:[#allocation9 + $0xa0] sm:$0xff] %v1320_v53  ;;  %v831_v28 = vcvt.s32.f32 %v767_v54  ;;  %v401_v9 = vmul.f32 0.5, %v310_v20 }
 0x10f   :  { %v1246_v33 = vmul.f32 %v1182_v47, %v590_v11  ;;  %v558_v61 = vmul.f32 0.5, %v1600_v57  ;;  %v959_v2 = vcvt.s32.f32 %v895_v55  ;;  %v1183_v36 = vsub.f32 %v1055_v62, %v1119_v48 }
 0x110   :  { %v1602_v4 = vpop.eup %1601  ;;  %v800_v60 = vcvt.s32.f32 %v736_v63  ;;  %v928_v5 = vcvt.s32.f32 %v864_v34  ;;  %v1151_v14 = vmul.f32 2.0, %v831_v28  ;;  %1605 = vtanh.f32 %v401_v9 }
 0x111   :  { %v622_v32 = vadd.f32 0.5, %v558_v61  ;;  %v559_v35 = vmul.f32 0.5, %v1602_v4  ;;  %v1023_v13 = vadd.f32 %v959_v2, %v831_v28  ;;  %v1247_v22 = vmul.f32 %v1183_v36, %v591_v52  ;;  %v313_v52 = vpop.f32.mrf.mxu1 }
 0x112   :  { %v992_v37 = vadd.f32 %v928_v5, %v800_v60  ;;  %v1120_v8 = vmul.f32 2.0, %v800_v60  ;;  %v673_v26 = vunpack.c.2.s8 %v1946_v44  ;;  %v432_v7 = vmul.f32 0.5, %v245_v1  ;;  %v248_v1 = vpop.f32.mrf.mxu2 }
 0x113   :  { %v1086_v6 = vmul.f32 %v1022_v31, %v622_v32  ;;  %v623_v24 = vadd.f32 0.5, %v559_v35  ;;  %v1604_v19 = vpop.eup %1603  ;;  %v1305_v39 = vadd.f32 %v1247_v22, %v1246_v33  ;;  %v704_v40 = vunpack.c.2.s8 %v1948_v45 }
 0x114   :  { %v433_v23 = vmul.f32 0.5, %v358_v15  ;;  %v705_v10 = vunpack.c.2.s8 %v1965_v27  ;;  %v528_v3 = vmul.f32 0.5, %v1604_v19  ;;  %v737_v58 = vshra.s32 %v673_v26, 1 }
 0x115   :  { %v1214_v16 = vsub.f32 %v1086_v6, %v1150_v49  ;;  %v1087_v42 = vmul.f32 %v1023_v13, %v623_v24  ;;  %1468 = vst [vmem:[#allocation9 + $0x28] sm:$0xff] %v1305_v39  ;;  %v865_v21 = vand.u32 1, %v673_v26  ;;  %1607 = vtanh.f32 %v432_v7  ;;  %v361_v26 = vpop.f32.mrf.mxu3 }
 0x116   :  { %v768_v41 = vshra.s32 %v704_v40, 1  ;;  %v896_v59 = vand.u32 1, %v704_v40  ;;  %v592_v46 = vadd.f32 0.5, %v528_v3  ;;  %v801_v11 = vcvt.s32.f32 %v737_v58  ;;  %v1606_v30 = vpop.eup %1605 }
 0x117   :  { %v1278_v17 = vmul.f32 %v1214_v16, %v622_v32  ;;  %v1215_v18 = vsub.f32 %v1087_v42, %v1151_v14  ;;  %v929_v48 = vcvt.s32.f32 %v865_v21  ;;  %1609 = vtanh.f32 %v433_v23 }
 0x118   :  { %v832_v50 = vcvt.s32.f32 %v768_v41  ;;  %v960_v43 = vcvt.s32.f32 %v896_v59  ;;  %v1056_v51 = vmul.f32 %v992_v37, %v592_v46  ;;  %v529_v25 = vmul.f32 0.5, %v1606_v30 }
 0x119   :  { %v1279_v56 = vmul.f32 %v1215_v18, %v623_v24  ;;  %v1121_v38 = vmul.f32 2.0, %v801_v11  ;;  %v993_v31 = vadd.f32 %v929_v48, %v801_v11  ;;  %v769_v53 = vshra.s32 %v705_v10, 1 }
 0x11a   :  { %v1024_v49 = vadd.f32 %v960_v43, %v832_v50  ;;  %v1152_v0 = vmul.f32 2.0, %v832_v50  ;;  %v1184_v54 = vsub.f32 %v1056_v51, %v1120_v8  ;;  %v593_v55 = vadd.f32 0.5, %v529_v25  ;;  %v203_v43 = vpop.f32.mrf.mxu0 }
 0x11b   :  { %v1321_v47 = vadd.f32 %v1279_v56, %v1278_v17  ;;  %v897_v20 = vand.u32 1, %v705_v10  ;;  %v1608_v57 = vpop.eup %1607  ;;  %v833_v62 = vcvt.s32.f32 %v769_v53  ;;  %v402_v63 = vmul.f32 0.5, %v200_v29 }
 0x11c   :  { %v674_v34 = vunpack.c.3.s8 %v1908_v12  ;;  %v403_v33 = vmul.f32 0.5, %v313_v52  ;;  %v1248_v61 = vmul.f32 %v1184_v54, %v592_v46  ;;  %v1057_v28 = vmul.f32 %v993_v31, %v593_v55  ;;  %v316_v31 = vpop.f32.mrf.mxu1  ;;  %v1981_v54 = vld [vmem:[#allocation8 + $0x20] sm:$0xff] }
 0x11d   :  { %1484 = vst [vmem:[#allocation9 + $0xa8] sm:$0xff] %v1321_v47  ;;  %v560_v2 = vmul.f32 0.5, %v1608_v57  ;;  %v961_v4 = vcvt.s32.f32 %v897_v20  ;;  %v1610_v36 = vpop.eup %1609  ;;  %v1153_v60 = vmul.f32 2.0, %v833_v62  ;;  %1611 = vtanh.f32 %v402_v63  ;;  %v1983_v63 = vld [vmem:[#allocation8 + $0x28] sm:$0xff] }
 0x11e   :  { %v738_v5 = vshra.s32 %v674_v34, 1  ;;  %v866_v9 = vand.u32 1, %v674_v34  ;;  %v1185_v32 = vsub.f32 %v1057_v28, %v1121_v38  ;;  %v561_v13 = vmul.f32 0.5, %v1610_v36 }
 0x11f   :  { %v624_v35 = vadd.f32 0.5, %v560_v2  ;;  %v1025_v14 = vadd.f32 %v961_v4, %v833_v62  ;;  %1613 = vtanh.f32 %v403_v33  ;;  %v675_v12 = vunpack.c.3.s8 %v1946_v44 }
 0x120   :  { %v802_v15 = vcvt.s32.f32 %v738_v5  ;;  %v930_v22 = vcvt.s32.f32 %v866_v9  ;;  %v1249_v37 = vmul.f32 %v1185_v32, %v593_v55  ;;  %v625_v6 = vadd.f32 0.5, %v561_v13 }
 0x121   :  { %v1088_v8 = vmul.f32 %v1024_v49, %v624_v35  ;;  %v434_v24 = vmul.f32 0.5, %v248_v1  ;;  %v739_v39 = vshra.s32 %v675_v12, 1  ;;  %v867_v40 = vand.u32 1, %v675_v12 }
 0x122   :  { %v994_v7 = vadd.f32 %v930_v22, %v802_v15  ;;  %v1122_v19 = vmul.f32 2.0, %v802_v15  ;;  %v1306_v23 = vadd.f32 %v1249_v37, %v1248_v61  ;;  %v1089_v16 = vmul.f32 %v1025_v14, %v625_v6  ;;  %v251_v22 = vpop.f32.mrf.mxu2 }
 0x123   :  { %v1216_v10 = vsub.f32 %v1088_v8, %v1152_v0  ;;  %1615 = vtanh.f32 %v434_v24  ;;  %v1612_v42 = vpop.eup %1611  ;;  %v803_v3 = vcvt.s32.f32 %v739_v39  ;;  %v931_v58 = vcvt.s32.f32 %v867_v40 }
 0x124   :  { %v706_v21 = vunpack.c.3.s8 %v1948_v45  ;;  %v435_v41 = vmul.f32 0.5, %v361_v26  ;;  %1469 = vst [vmem:[#allocation9 + $0x30] sm:$0xff] %v1306_v23  ;;  %v1217_v59 = vsub.f32 %v1089_v16, %v1153_v60  ;;  %v530_v17 = vmul.f32 0.5, %v1612_v42  ;;  %v1987_v16 = vld [vmem:[#allocation8 + $0x60] sm:$0xff]  ;;  %v364_v42 = vpop.f32.mrf.mxu3 }
 0x125   :  { %v1280_v44 = vmul.f32 %v1216_v10, %v624_v35  ;;  %v707_v18 = vunpack.c.3.s8 %v1965_v27  ;;  %v1614_v46 = vpop.eup %1613  ;;  %v995_v11 = vadd.f32 %v931_v58, %v803_v3  ;;  %v1123_v30 = vmul.f32 2.0, %v803_v3 }
 0x126   :  { %v770_v48 = vshra.s32 %v706_v21, 1  ;;  %v898_v50 = vand.u32 1, %v706_v21  ;;  %v1281_v56 = vmul.f32 %v1217_v59, %v625_v6  ;;  %v594_v51 = vadd.f32 0.5, %v530_v17  ;;  %v206_v59 = vpop.f32.mrf.mxu0  ;;  %v319_v17 = vpop.f32.mrf.mxu1 }
 0x127   :  { %v531_v25 = vmul.f32 0.5, %v1614_v46  ;;  %1617 = vtanh.f32 %v435_v41  ;;  %v771_v45 = vshra.s32 %v707_v18, 1  ;;  %v899_v52 = vand.u32 1, %v707_v18 }
 0x128   :  { %v834_v38 = vcvt.s32.f32 %v770_v48  ;;  %v962_v29 = vcvt.s32.f32 %v898_v50  ;;  %v1322_v0 = vadd.f32 %v1281_v56, %v1280_v44  ;;  %v1058_v53 = vmul.f32 %v994_v7, %v594_v51  ;;  %v1989_v44 = vld [vmem:[#allocation8 + $0x68] sm:$0xff] }
 0x129   :  { %v1616_v49 = vpop.eup %1615  ;;  %v595_v47 = vadd.f32 0.5, %v531_v25  ;;  %v404_v27 = vmul.f32 0.5, %v203_v43  ;;  %v835_v62 = vcvt.s32.f32 %v771_v45  ;;  %v963_v61 = vcvt.s32.f32 %v899_v52 }
 0x12a   :  { %v562_v55 = vmul.f32 0.5, %v1616_v49  ;;  %v1026_v20 = vadd.f32 %v962_v29, %v834_v38  ;;  %v1154_v57 = vmul.f32 2.0, %v834_v38  ;;  %1485 = vst [vmem:[#allocation9 + $0xb0] sm:$0xff] %v1322_v0  ;;  %v1186_v34 = vsub.f32 %v1058_v53, %v1122_v19 }
 0x12b   :  { %v1059_v33 = vmul.f32 %v995_v11, %v595_v47  ;;  %1619 = vtanh.f32 %v404_v27  ;;  %v1155_v2 = vmul.f32 2.0, %v835_v62  ;;  %v676_v4 = vunpack.c.0.s8 %v1981_v54 }
 0x12c   :  { %v626_v28 = vadd.f32 0.5, %v562_v55  ;;  %v405_v36 = vmul.f32 0.5, %v316_v31  ;;  %v1250_v5 = vmul.f32 %v1186_v34, %v594_v51  ;;  %v1027_v1 = vadd.f32 %v963_v61, %v835_v62 }
 0x12d   :  { %v1618_v60 = vpop.eup %1617  ;;  %v1187_v9 = vsub.f32 %v1059_v33, %v1123_v30  ;;  %v677_v32 = vunpack.c.0.s8 %v1983_v63  ;;  %v740_v14 = vshra.s32 %v676_v4, 1  ;;  %v868_v15 = vand.u32 1, %v676_v4 }
 0x12e   :  { %v1090_v35 = vmul.f32 %v1026_v20, %v626_v28  ;;  %v563_v13 = vmul.f32 0.5, %v1618_v60  ;;  %1621 = vtanh.f32 %v405_v36  ;;  %v436_v10 = vmul.f32 0.5, %v251_v22  ;;  %v254_v60 = vpop.f32.mrf.mxu2 }
 0x12f   :  { %v1251_v12 = vmul.f32 %v1187_v9, %v595_v47  ;;  %v741_v37 = vshra.s32 %v677_v32, 1  ;;  %v869_v8 = vand.u32 1, %v677_v32  ;;  %v804_v26 = vcvt.s32.f32 %v740_v14 }
 0x130   :  { %v1218_v6 = vsub.f32 %v1090_v35, %v1154_v57  ;;  %v627_v24 = vadd.f32 0.5, %v563_v13  ;;  %v932_v7 = vcvt.s32.f32 %v868_v15  ;;  %1623 = vtanh.f32 %v436_v10 }
 0x131   :  { %v1620_v19 = vpop.eup %1619  ;;  %v1307_v39 = vadd.f32 %v1251_v12, %v1250_v5  ;;  %v805_v40 = vcvt.s32.f32 %v741_v37  ;;  %v933_v23 = vcvt.s32.f32 %v869_v8  ;;  %v1124_v18 = vmul.f32 2.0, %v804_v26 }
 0x132   :  { %v1282_v3 = vmul.f32 %v1218_v6, %v626_v28  ;;  %v1091_v58 = vmul.f32 %v1027_v1, %v627_v24  ;;  %v532_v21 = vmul.f32 0.5, %v1620_v19  ;;  %v996_v41 = vadd.f32 %v932_v7, %v804_v26 }
 0x133   :  { %1470 = vst [vmem:[#allocation9 + $0x38] sm:$0xff] %v1307_v39  ;;  %v997_v46 = vadd.f32 %v933_v23, %v805_v40  ;;  %v1125_v11 = vmul.f32 2.0, %v805_v40  ;;  %v708_v50 = vunpack.c.0.s8 %v1987_v16  ;;  %v437_v43 = vmul.f32 0.5, %v364_v42 }
 0x134   :  { %v1219_v30 = vsub.f32 %v1091_v58, %v1155_v2  ;;  %v596_v48 = vadd.f32 0.5, %v532_v21  ;;  %v1622_v56 = vpop.eup %1621  ;;  %v709_v51 = vunpack.c.0.s8 %v1989_v44  ;;  %v406_v25 = vmul.f32 0.5, %v206_v59 }
 0x135   :  { %v678_v38 = vunpack.c.1.s8 %v1981_v54  ;;  %v407_v29 = vmul.f32 0.5, %v319_v17  ;;  %v533_v31 = vmul.f32 0.5, %v1622_v56  ;;  %v772_v49 = vshra.s32 %v708_v50, 1 }
 0x136   :  { %v1283_v45 = vmul.f32 %v1219_v30, %v627_v24  ;;  %v1060_v52 = vmul.f32 %v996_v41, %v596_v48  ;;  %v900_v0 = vand.u32 1, %v708_v50  ;;  %1625 = vtanh.f32 %v437_v43  ;;  %v1624_v62 = vpop.eup %1623  ;;  %v209_v43 = vpop.f32.mrf.mxu0 }
 0x137   :  { %v773_v53 = vshra.s32 %v709_v51, 1  ;;  %v901_v47 = vand.u32 1, %v709_v51  ;;  %v597_v20 = vadd.f32 0.5, %v533_v31  ;;  %v836_v57 = vcvt.s32.f32 %v772_v49 }
 0x138   :  { %v1323_v27 = vadd.f32 %v1283_v45, %v1282_v3  ;;  %v1188_v55 = vsub.f32 %v1060_v52, %v1124_v18  ;;  %v964_v34 = vcvt.s32.f32 %v900_v0  ;;  %1627 = vtanh.f32 %v406_v25  ;;  %v367_v18 = vpop.f32.mrf.mxu3 }
 0x139   :  { %v837_v33 = vcvt.s32.f32 %v773_v53  ;;  %v965_v61 = vcvt.s32.f32 %v901_v47  ;;  %v1061_v2 = vmul.f32 %v997_v46, %v597_v20  ;;  %v564_v4 = vmul.f32 0.5, %v1624_v62 }
 0x13a   :  { %1486 = vst [vmem:[#allocation9 + $0xb8] sm:$0xff] %v1323_v27  ;;  %v1252_v28 = vmul.f32 %v1188_v55, %v596_v48  ;;  %v1156_v36 = vmul.f32 2.0, %v836_v57  ;;  %v1028_v5 = vadd.f32 %v964_v34, %v836_v57  ;;  %v742_v32 = vshra.s32 %v678_v38, 1 }
 0x13b   :  { %v1029_v9 = vadd.f32 %v965_v61, %v837_v33  ;;  %v1157_v1 = vmul.f32 2.0, %v837_v33  ;;  %v1189_v35 = vsub.f32 %v1061_v2, %v1125_v11  ;;  %v628_v13 = vadd.f32 0.5, %v564_v4  ;;  %v257_v2 = vpop.f32.mrf.mxu2 }
 0x13c   :  { %v870_v14 = vand.u32 1, %v678_v38  ;;  %1629 = vtanh.f32 %v407_v29  ;;  %v1626_v15 = vpop.eup %1625  ;;  %v806_v22 = vcvt.s32.f32 %v742_v32  ;;  %v679_v12 = vunpack.c.1.s8 %v1983_v63 }
 0x13d   :  { %v438_v37 = vmul.f32 0.5, %v254_v60  ;;  %v710_v8 = vunpack.c.1.s8 %v1987_v16  ;;  %v1253_v6 = vmul.f32 %v1189_v35, %v597_v20  ;;  %v1092_v24 = vmul.f32 %v1028_v5, %v628_v13 }
 0x13e   :  { %v565_v26 = vmul.f32 0.5, %v1626_v15  ;;  %v934_v7 = vcvt.s32.f32 %v870_v14  ;;  %v1628_v19 = vpop.eup %1627  ;;  %v1126_v39 = vmul.f32 2.0, %v806_v22  ;;  %v743_v40 = vshra.s32 %v679_v12, 1 }
 0x13f   :  { %v871_v23 = vand.u32 1, %v679_v12  ;;  %1631 = vtanh.f32 %v438_v37  ;;  %v1308_v10 = vadd.f32 %v1253_v6, %v1252_v28  ;;  %v1220_v42 = vsub.f32 %v1092_v24, %v1156_v36  ;;  %v322_v28 = vpop.f32.mrf.mxu1 }
 0x140   :  { %v629_v3 = vadd.f32 0.5, %v565_v26  ;;  %v534_v58 = vmul.f32 0.5, %v1628_v19  ;;  %v998_v21 = vadd.f32 %v934_v7, %v806_v22  ;;  %v807_v41 = vcvt.s32.f32 %v743_v40 }
 0x141   :  { %v935_v59 = vcvt.s32.f32 %v871_v23  ;;  %v774_v17 = vshra.s32 %v710_v8, 1  ;;  %1471 = vst [vmem:[#allocation9 + $0x40] sm:$0xff] %v1308_v10  ;;  %v1284_v11 = vmul.f32 %v1220_v42, %v628_v13  ;;  %v902_v50 = vand.u32 1, %v710_v8  ;;  %v370_v23 = vpop.f32.mrf.mxu3 }
 0x142   :  { %v1630_v46 = vpop.eup %1629  ;;  %v1093_v30 = vmul.f32 %v1029_v9, %v629_v3  ;;  %v598_v48 = vadd.f32 0.5, %v534_v58  ;;  %v1127_v25 = vmul.f32 2.0, %v807_v41  ;;  %v439_v31 = vmul.f32 0.5, %v367_v18 }
 0x143   :  { %v535_v56 = vmul.f32 0.5, %v1630_v46  ;;  %v999_v51 = vadd.f32 %v935_v59, %v807_v41  ;;  %v838_v38 = vcvt.s32.f32 %v774_v17  ;;  %v966_v52 = vcvt.s32.f32 %v902_v50  ;;  %v212_v46 = vpop.f32.mrf.mxu0 }
 0x144   :  { %v1221_v29 = vsub.f32 %v1093_v30, %v1157_v1  ;;  %v1062_v45 = vmul.f32 %v998_v21, %v598_v48  ;;  %v711_v47 = vunpack.c.1.s8 %v1989_v44  ;;  %v408_v27 = vmul.f32 0.5, %v209_v43 }
 0x145   :  { %v1632_v49 = vpop.eup %1631  ;;  %v599_v0 = vadd.f32 0.5, %v535_v56  ;;  %v1158_v53 = vmul.f32 2.0, %v838_v38  ;;  %v1030_v62 = vadd.f32 %v966_v52, %v838_v38  ;;  %1633 = vtanh.f32 %v439_v31 }
 0x146   :  { %v1285_v55 = vmul.f32 %v1221_v29, %v629_v3  ;;  %v1190_v20 = vsub.f32 %v1062_v45, %v1126_v39  ;;  %v566_v57 = vmul.f32 0.5, %v1632_v49  ;;  %v775_v33 = vshra.s32 %v711_v47, 1 }
 0x147   :  { %v1063_v34 = vmul.f32 %v999_v51, %v599_v0  ;;  %v903_v61 = vand.u32 1, %v711_v47  ;;  %1635 = vtanh.f32 %v408_v27  ;;  %v680_v32 = vunpack.c.2.s8 %v1981_v54 }
 0x148   :  { %v1324_v4 = vadd.f32 %v1285_v55, %v1284_v11  ;;  %v1254_v36 = vmul.f32 %v1190_v20, %v598_v48  ;;  %v630_v60 = vadd.f32 0.5, %v566_v57  ;;  %v839_v9 = vcvt.s32.f32 %v775_v33 }
 0x149   :  { %v1191_v5 = vsub.f32 %v1063_v34, %v1127_v25  ;;  %v967_v1 = vcvt.s32.f32 %v903_v61  ;;  %v409_v13 = vmul.f32 0.5, %v322_v28  ;;  %v681_v14 = vunpack.c.2.s8 %v1983_v63 }
 0x14a   :  { %1487 = vst [vmem:[#allocation9 + $0xc0] sm:$0xff] %v1324_v4  ;;  %v1094_v35 = vmul.f32 %v1030_v62, %v630_v60  ;;  %v440_v15 = vmul.f32 0.5, %v257_v2  ;;  %v1159_v37 = vmul.f32 2.0, %v839_v9  ;;  %v744_v8 = vshra.s32 %v680_v32, 1 }
 0x14b   :  { %v1255_v22 = vmul.f32 %v1191_v5, %v599_v0  ;;  %v1031_v12 = vadd.f32 %v967_v1, %v839_v9  ;;  %v872_v24 = vand.u32 1, %v680_v32  ;;  %1637 = vtanh.f32 %v409_v13  ;;  %v1634_v7 = vpop.eup %1633  ;;  %v325_v1 = vpop.f32.mrf.mxu1 }
 0x14c   :  { %v1222_v6 = vsub.f32 %v1094_v35, %v1158_v53  ;;  %v745_v26 = vshra.s32 %v681_v14, 1  ;;  %v808_v39 = vcvt.s32.f32 %v744_v8  ;;  %v873_v40 = vand.u32 1, %v681_v14  ;;  %v260_v32 = vpop.f32.mrf.mxu2 }
 0x14d   :  { %v1309_v19 = vadd.f32 %v1255_v22, %v1254_v36  ;;  %1639 = vtanh.f32 %v440_v15  ;;  %v1636_v10 = vpop.eup %1635  ;;  %v567_v3 = vmul.f32 0.5, %v1634_v7  ;;  %v936_v58 = vcvt.s32.f32 %v872_v24 }
 0x14e   :  { %v1286_v42 = vmul.f32 %v1222_v6, %v630_v60  ;;  %v809_v21 = vcvt.s32.f32 %v745_v26  ;;  %v536_v41 = vmul.f32 0.5, %v1636_v10  ;;  %v1128_v59 = vmul.f32 2.0, %v808_v39 }
 0x14f   :  { %1472 = vst [vmem:[#allocation9 + $0x48] sm:$0xff] %v1309_v19  ;;  %v937_v17 = vcvt.s32.f32 %v873_v40  ;;  %v712_v18 = vunpack.c.2.s8 %v1987_v16  ;;  %v631_v11 = vadd.f32 0.5, %v567_v3  ;;  %v1000_v30 = vadd.f32 %v936_v58, %v808_v39  ;;  %v373_v58 = vpop.f32.mrf.mxu3 }
 0x150   :  { %v1129_v48 = vmul.f32 2.0, %v809_v21  ;;  %v441_v50 = vmul.f32 0.5, %v370_v23  ;;  %v600_v43 = vadd.f32 0.5, %v536_v41  ;;  %v713_v45 = vunpack.c.2.s8 %v1989_v44 }
 0x151   :  { %v1001_v56 = vadd.f32 %v937_v17, %v809_v21  ;;  %v776_v51 = vshra.s32 %v712_v18, 1  ;;  %v904_v25 = vand.u32 1, %v712_v18  ;;  %v1638_v38 = vpop.eup %1637  ;;  %v1095_v29 = vmul.f32 %v1031_v12, %v631_v11 }
 0x152   :  { %1641 = vtanh.f32 %v441_v50  ;;  %v410_v52 = vmul.f32 0.5, %v212_v46  ;;  %v1064_v49 = vmul.f32 %v1000_v30, %v600_v43  ;;  %v537_v0 = vmul.f32 0.5, %v1638_v38  ;;  %v215_v46 = vpop.f32.mrf.mxu0 }
 0x153   :  { %v1640_v31 = vpop.eup %1639  ;;  %v840_v53 = vcvt.s32.f32 %v776_v51  ;;  %v968_v47 = vcvt.s32.f32 %v904_v25  ;;  %v1223_v27 = vsub.f32 %v1095_v29, %v1159_v37  ;;  %v777_v20 = vshra.s32 %v713_v45, 1 }
 0x154   :  { %v568_v55 = vmul.f32 0.5, %v1640_v31  ;;  %v905_v57 = vand.u32 1, %v713_v45  ;;  %v1192_v62 = vsub.f32 %v1064_v49, %v1128_v59  ;;  %v601_v34 = vadd.f32 0.5, %v537_v0  ;;  %v2005_v49 = vld [vmem:[#allocation8 + $0x30] sm:$0xff] }
 0x155   :  { %v1032_v33 = vadd.f32 %v968_v47, %v840_v53  ;;  %v1160_v61 = vmul.f32 2.0, %v840_v53  ;;  %v1287_v28 = vmul.f32 %v1223_v27, %v631_v11  ;;  %v841_v4 = vcvt.s32.f32 %v777_v20 }
 0x156   :  { %v632_v2 = vadd.f32 0.5, %v568_v55  ;;  %v969_v36 = vcvt.s32.f32 %v905_v57  ;;  %v1256_v60 = vmul.f32 %v1192_v62, %v600_v43  ;;  %v1065_v5 = vmul.f32 %v1001_v56, %v601_v34 }
 0x157   :  { %1643 = vtanh.f32 %v410_v52  ;;  %v682_v9 = vunpack.c.3.s8 %v1981_v54  ;;  %v1325_v13 = vadd.f32 %v1287_v28, %v1286_v42  ;;  %v1161_v22 = vmul.f32 2.0, %v841_v4  ;;  %v328_v28 = vpop.f32.mrf.mxu1 }
 0x158   :  { %v1642_v35 = vpop.eup %1641  ;;  %v1096_v14 = vmul.f32 %v1032_v33, %v632_v2  ;;  %v1033_v15 = vadd.f32 %v969_v36, %v841_v4  ;;  %v1193_v12 = vsub.f32 %v1065_v5, %v1129_v48  ;;  %v411_v26 = vmul.f32 0.5, %v325_v1  ;;  %v2008_v5 = vld [vmem:[#allocation8 + $0x38] sm:$0xff] }
 0x159   :  { %v569_v37 = vmul.f32 0.5, %v1642_v35  ;;  %v746_v8 = vshra.s32 %v682_v9, 1  ;;  %v874_v6 = vand.u32 1, %v682_v9  ;;  %1488 = vst [vmem:[#allocation9 + $0xc8] sm:$0xff] %v1325_v13  ;;  %v683_v7 = vunpack.c.3.s8 %v1983_v63  ;;  %v263_v9 = vpop.f32.mrf.mxu2 }
 0x15a   :  { %v1224_v24 = vsub.f32 %v1096_v14, %v1160_v61  ;;  %v442_v19 = vmul.f32 0.5, %v260_v32  ;;  %v1257_v39 = vmul.f32 %v1193_v12, %v601_v34  ;;  %1645 = vtanh.f32 %v411_v26 }
 0x15b   :  { %v633_v40 = vadd.f32 0.5, %v569_v37  ;;  %v810_v54 = vcvt.s32.f32 %v746_v8  ;;  %v938_v23 = vcvt.s32.f32 %v874_v6  ;;  %v747_v42 = vshra.s32 %v683_v7, 1 }
 0x15c   :  { %v1288_v10 = vmul.f32 %v1224_v24, %v632_v2  ;;  %v875_v3 = vand.u32 1, %v683_v7  ;;  %v1310_v41 = vadd.f32 %v1257_v39, %v1256_v60  ;;  %1647 = vtanh.f32 %v442_v19 }
 0x15d   :  { %v1644_v21 = vpop.eup %1643  ;;  %v1097_v59 = vmul.f32 %v1033_v15, %v633_v40  ;;  %v1002_v17 = vadd.f32 %v938_v23, %v810_v54  ;;  %v1130_v18 = vmul.f32 2.0, %v810_v54  ;;  %v811_v30 = vcvt.s32.f32 %v747_v42 }
 0x15e   :  { %v538_v11 = vmul.f32 0.5, %v1644_v21  ;;  %v939_v48 = vcvt.s32.f32 %v875_v3  ;;  %1473 = vst [vmem:[#allocation9 + $0x50] sm:$0xff] %v1310_v41  ;;  %v714_v50 = vunpack.c.3.s8 %v1987_v16  ;;  %v443_v43 = vmul.f32 0.5, %v373_v58  ;;  %v2011_v3 = vld [vmem:[#allocation8 + $0x70] sm:$0xff] }
 0x15f   :  { %v1225_v63 = vsub.f32 %v1097_v59, %v1161_v22  ;;  %v715_v56 = vunpack.c.3.s8 %v1989_v44  ;;  %v1131_v38 = vmul.f32 2.0, %v811_v30  ;;  %v412_v29 = vmul.f32 0.5, %v215_v46 }
 0x160   :  { %v602_v51 = vadd.f32 0.5, %v538_v11  ;;  %v1003_v25 = vadd.f32 %v939_v48, %v811_v30  ;;  %v778_v52 = vshra.s32 %v714_v50, 1  ;;  %v906_v31 = vand.u32 1, %v714_v50  ;;  %v1646_v0 = vpop.eup %1645  ;;  %v2013_v30 = vld [vmem:[#allocation8 + $0x78] sm:$0xff] }
 0x161   :  { %v1289_v45 = vmul.f32 %v1225_v63, %v633_v40  ;;  %1649 = vtanh.f32 %v443_v43  ;;  %v779_v47 = vshra.s32 %v715_v56, 1  ;;  %v907_v27 = vand.u32 1, %v715_v56  ;;  %v218_v56 = vpop.f32.mrf.mxu0 }
 0x162   :  { %v1066_v53 = vmul.f32 %v1002_v17, %v602_v51  ;;  %1651 = vtanh.f32 %v412_v29  ;;  %v539_v16 = vmul.f32 0.5, %v1646_v0  ;;  %v842_v20 = vcvt.s32.f32 %v778_v52  ;;  %v1648_v44 = vpop.eup %1647  ;;  %v376_v17 = vpop.f32.mrf.mxu3 }
 0x163   :  { %v1326_v55 = vadd.f32 %v1289_v45, %v1288_v10  ;;  %v970_v57 = vcvt.s32.f32 %v906_v31  ;;  %v843_v34 = vcvt.s32.f32 %v779_v47  ;;  %v971_v33 = vcvt.s32.f32 %v907_v27 }
 0x164   :  { %v1194_v62 = vsub.f32 %v1066_v53, %v1130_v18  ;;  %v684_v61 = vunpack.c.0.s8 %v2005_v49  ;;  %v603_v2 = vadd.f32 0.5, %v539_v16  ;;  %v570_v4 = vmul.f32 0.5, %v1648_v44 }
 0x165   :  { %1489 = vst [vmem:[#allocation9 + $0xd0] sm:$0xff] %v1326_v55  ;;  %v1034_v36 = vadd.f32 %v970_v57, %v842_v20  ;;  %v1162_v60 = vmul.f32 2.0, %v842_v20  ;;  %v1035_v32 = vadd.f32 %v971_v33, %v843_v34  ;;  %v1163_v35 = vmul.f32 2.0, %v843_v34 }
 0x166   :  { %v1258_v1 = vmul.f32 %v1194_v62, %v602_v51  ;;  %v748_v13 = vshra.s32 %v684_v61, 1  ;;  %v1067_v15 = vmul.f32 %v1003_v25, %v603_v2  ;;  %v634_v22 = vadd.f32 0.5, %v570_v4  ;;  %v331_v62 = vpop.f32.mrf.mxu1 }
 0x167   :  { %v1650_v14 = vpop.eup %1649  ;;  %v876_v12 = vand.u32 1, %v684_v61  ;;  %v413_v37 = vmul.f32 0.5, %v328_v28  ;;  %v685_v26 = vunpack.c.0.s8 %v2008_v5  ;;  %v444_v7 = vmul.f32 0.5, %v263_v9 }
 0x168   :  { %v1652_v8 = vpop.eup %1651  ;;  %v571_v6 = vmul.f32 0.5, %v1650_v14  ;;  %v812_v24 = vcvt.s32.f32 %v748_v13  ;;  %v1195_v19 = vsub.f32 %v1067_v15, %v1131_v38  ;;  %v1098_v39 = vmul.f32 %v1034_v36, %v634_v22 }
 0x169   :  { %v540_v40 = vmul.f32 0.5, %v1652_v8  ;;  %v940_v54 = vcvt.s32.f32 %v876_v12  ;;  %1653 = vtanh.f32 %v413_v37  ;;  %v749_v42 = vshra.s32 %v685_v26, 1 }
 0x16a   :  { %v635_v23 = vadd.f32 0.5, %v571_v6  ;;  %v1132_v10 = vmul.f32 2.0, %v812_v24  ;;  %v1259_v58 = vmul.f32 %v1195_v19, %v603_v2  ;;  %v1226_v21 = vsub.f32 %v1098_v39, %v1162_v60  ;;  %v266_v2 = vpop.f32.mrf.mxu2 }
 0x16b   :  { %v604_v41 = vadd.f32 0.5, %v540_v40  ;;  %v1004_v59 = vadd.f32 %v940_v54, %v812_v24  ;;  %v813_v46 = vcvt.s32.f32 %v749_v42  ;;  %v877_v11 = vand.u32 1, %v685_v26 }
 0x16c   :  { %v1099_v18 = vmul.f32 %v1035_v32, %v635_v23  ;;  %1655 = vtanh.f32 %v444_v7  ;;  %v1311_v48 = vadd.f32 %v1259_v58, %v1258_v1  ;;  %v1290_v63 = vmul.f32 %v1226_v21, %v634_v22 }
 0x16d   :  { %v1068_v50 = vmul.f32 %v1004_v59, %v604_v41  ;;  %v716_v43 = vunpack.c.0.s8 %v2011_v3  ;;  %v941_v25 = vcvt.s32.f32 %v877_v11  ;;  %v1133_v38 = vmul.f32 2.0, %v813_v46 }
 0x16e   :  { %v1227_v51 = vsub.f32 %v1099_v18, %v1163_v35  ;;  %v445_v29 = vmul.f32 0.5, %v376_v17  ;;  %1474 = vst [vmem:[#allocation9 + $0x58] sm:$0xff] %v1311_v48  ;;  %v717_v0 = vunpack.c.0.s8 %v2013_v30  ;;  %v414_v55 = vmul.f32 0.5, %v218_v56  ;;  %v379_v48 = vpop.f32.mrf.mxu3 }
 0x16f   :  { %v1196_v45 = vsub.f32 %v1068_v50, %v1132_v10  ;;  %v780_v52 = vshra.s32 %v716_v43, 1  ;;  %v908_v31 = vand.u32 1, %v716_v43  ;;  %v1654_v53 = vpop.eup %1653  ;;  %v1005_v27 = vadd.f32 %v941_v25, %v813_v46 }
 0x170   :  { %v1291_v47 = vmul.f32 %v1227_v51, %v635_v23  ;;  %1657 = vtanh.f32 %v445_v29  ;;  %v541_v20 = vmul.f32 0.5, %v1654_v53  ;;  %v781_v61 = vshra.s32 %v717_v0, 1  ;;  %v221_v51 = vpop.f32.mrf.mxu0 }
 0x171   :  { %v1260_v16 = vmul.f32 %v1196_v45, %v604_v41  ;;  %v844_v57 = vcvt.s32.f32 %v780_v52  ;;  %v972_v44 = vcvt.s32.f32 %v908_v31  ;;  %v909_v28 = vand.u32 1, %v717_v0 }
 0x172   :  { %v1656_v34 = vpop.eup %1655  ;;  %v1327_v33 = vadd.f32 %v1291_v47, %v1290_v63  ;;  %1659 = vtanh.f32 %v414_v55  ;;  %v605_v4 = vadd.f32 0.5, %v541_v20  ;;  %v845_v1 = vcvt.s32.f32 %v781_v61 }
 0x173   :  { %v572_v36 = vmul.f32 0.5, %v1656_v34  ;;  %v1036_v60 = vadd.f32 %v972_v44, %v844_v57  ;;  %v1164_v9 = vmul.f32 2.0, %v844_v57  ;;  %v973_v32 = vcvt.s32.f32 %v909_v28  ;;  %v334_v28 = vpop.f32.mrf.mxu1 }
 0x174   :  { %1490 = vst [vmem:[#allocation9 + $0xd8] sm:$0xff] %v1327_v33  ;;  %v686_v35 = vunpack.c.1.s8 %v2005_v49  ;;  %v415_v13 = vmul.f32 0.5, %v331_v62  ;;  %v1069_v14 = vmul.f32 %v1005_v27, %v605_v4  ;;  %v687_v22 = vunpack.c.1.s8 %v2008_v5 }
 0x175   :  { %v636_v15 = vadd.f32 0.5, %v572_v36  ;;  %v446_v12 = vmul.f32 0.5, %v266_v2  ;;  %v1037_v8 = vadd.f32 %v973_v32, %v845_v1  ;;  %v1165_v6 = vmul.f32 2.0, %v845_v1 }
 0x176   :  { %v1658_v37 = vpop.eup %1657  ;;  %v750_v24 = vshra.s32 %v686_v35, 1  ;;  %v878_v26 = vand.u32 1, %v686_v35  ;;  %v1197_v7 = vsub.f32 %v1069_v14, %v1133_v38  ;;  %1661 = vtanh.f32 %v415_v13 }
 0x177   :  { %v1100_v19 = vmul.f32 %v1036_v60, %v636_v15  ;;  %v573_v39 = vmul.f32 0.5, %v1658_v37  ;;  %v751_v10 = vshra.s32 %v687_v22, 1  ;;  %v879_v42 = vand.u32 1, %v687_v22  ;;  %v269_v60 = vpop.f32.mrf.mxu2 }
 0x178   :  { %v1660_v40 = vpop.eup %1659  ;;  %v814_v54 = vcvt.s32.f32 %v750_v24  ;;  %v942_v23 = vcvt.s32.f32 %v878_v26  ;;  %v1261_v58 = vmul.f32 %v1197_v7, %v605_v4  ;;  %1663 = vtanh.f32 %v446_v12 }
 0x179   :  { %v1228_v21 = vsub.f32 %v1100_v19, %v1164_v9  ;;  %v637_v41 = vadd.f32 0.5, %v573_v39  ;;  %v542_v59 = vmul.f32 0.5, %v1660_v40  ;;  %v815_v46 = vcvt.s32.f32 %v751_v10 }
 0x17a   :  { %v1006_v17 = vadd.f32 %v942_v23, %v814_v54  ;;  %v1134_v18 = vmul.f32 2.0, %v814_v54  ;;  %v943_v11 = vcvt.s32.f32 %v879_v42  ;;  %v1312_v63 = vadd.f32 %v1261_v58, %v1260_v16 }
 0x17b   :  { %v1292_v50 = vmul.f32 %v1228_v21, %v636_v15  ;;  %v1101_v43 = vmul.f32 %v1037_v8, %v637_v41  ;;  %v606_v56 = vadd.f32 0.5, %v542_v59  ;;  %v1135_v38 = vmul.f32 2.0, %v815_v46 }
 0x17c   :  { %v1007_v25 = vadd.f32 %v943_v11, %v815_v46  ;;  %v718_v29 = vunpack.c.1.s8 %v2011_v3  ;;  %v1662_v45 = vpop.eup %1661  ;;  %1475 = vst [vmem:[#allocation9 + $0x60] sm:$0xff] %v1312_v63  ;;  %v447_v0 = vmul.f32 0.5, %v379_v48  ;;  %v719_v53 = vunpack.c.1.s8 %v2013_v30  ;;  %v382_v11 = vpop.f32.mrf.mxu3 }
 0x17d   :  { %v1229_v52 = vsub.f32 %v1101_v43, %v1165_v6  ;;  %v1070_v31 = vmul.f32 %v1006_v17, %v606_v56  ;;  %v543_v47 = vmul.f32 0.5, %v1662_v45  ;;  %v416_v16 = vmul.f32 0.5, %v221_v51 }
 0x17e   :  { %v782_v27 = vshra.s32 %v718_v29, 1  ;;  %v910_v55 = vand.u32 1, %v718_v29  ;;  %1665 = vtanh.f32 %v447_v0  ;;  %v783_v44 = vshra.s32 %v719_v53, 1  ;;  %v1664_v9 = vpop.eup %1663 }
 0x17f   :  { %v1293_v20 = vmul.f32 %v1229_v52, %v637_v41  ;;  %v1198_v57 = vsub.f32 %v1070_v31, %v1134_v18  ;;  %v607_v62 = vadd.f32 0.5, %v543_v47  ;;  %v911_v61 = vand.u32 1, %v719_v53 }
 0x180   :  { %v846_v34 = vcvt.s32.f32 %v782_v27  ;;  %v974_v33 = vcvt.s32.f32 %v910_v55  ;;  %v847_v36 = vcvt.s32.f32 %v783_v44  ;;  %1667 = vtanh.f32 %v416_v16 }
 0x181   :  { %v1328_v2 = vadd.f32 %v1293_v20, %v1292_v50  ;;  %v1262_v4 = vmul.f32 %v1198_v57, %v606_v56  ;;  %v1071_v1 = vmul.f32 %v1007_v25, %v607_v62  ;;  %v975_v13 = vcvt.s32.f32 %v911_v61 }
 0x182   :  { %v1038_v32 = vadd.f32 %v974_v33, %v846_v34  ;;  %v1166_v35 = vmul.f32 2.0, %v846_v34  ;;  %v574_v14 = vmul.f32 0.5, %v1664_v9  ;;  %v1167_v15 = vmul.f32 2.0, %v847_v36  ;;  %v337_v9 = vpop.f32.mrf.mxu1 }
 0x183   :  { %1491 = vst [vmem:[#allocation9 + $0xe0] sm:$0xff] %v1328_v2  ;;  %v688_v22 = vunpack.c.2.s8 %v2005_v49  ;;  %v417_v12 = vmul.f32 0.5, %v334_v28  ;;  %v1199_v37 = vsub.f32 %v1071_v1, %v1135_v38  ;;  %v1039_v8 = vadd.f32 %v975_v13, %v847_v36  ;;  %v272_v13 = vpop.f32.mrf.mxu2 }
 0x184   :  { %v689_v6 = vunpack.c.2.s8 %v2008_v5  ;;  %v448_v24 = vmul.f32 0.5, %v269_v60  ;;  %v1666_v26 = vpop.eup %1665  ;;  %v638_v7 = vadd.f32 0.5, %v574_v14  ;;  %v720_v38 = vunpack.c.2.s8 %v2011_v3  ;;  %v224_v60 = vpop.f32.mrf.mxu0 }
 0x185   :  { %v752_v19 = vshra.s32 %v688_v22, 1  ;;  %v880_v39 = vand.u32 1, %v688_v22  ;;  %1669 = vtanh.f32 %v417_v12  ;;  %v1263_v40 = vmul.f32 %v1199_v37, %v607_v62 }
 0x186   :  { %v575_v54 = vmul.f32 0.5, %v1666_v26  ;;  %v753_v23 = vshra.s32 %v689_v6, 1  ;;  %v881_v10 = vand.u32 1, %v689_v6  ;;  %v1668_v42 = vpop.eup %1667  ;;  %v1102_v58 = vmul.f32 %v1038_v32, %v638_v7 }
 0x187   :  { %v816_v21 = vcvt.s32.f32 %v752_v19  ;;  %v944_v41 = vcvt.s32.f32 %v880_v39  ;;  %1671 = vtanh.f32 %v448_v24  ;;  %v1313_v59 = vadd.f32 %v1263_v40, %v1262_v4 }
 0x188   :  { %v639_v17 = vadd.f32 0.5, %v575_v54  ;;  %v544_v18 = vmul.f32 0.5, %v1668_v42  ;;  %v817_v46 = vcvt.s32.f32 %v753_v23  ;;  %v1230_v48 = vsub.f32 %v1102_v58, %v1166_v35 }
 0x189   :  { %v1008_v63 = vadd.f32 %v944_v41, %v816_v21  ;;  %v1136_v50 = vmul.f32 2.0, %v816_v21  ;;  %v945_v43 = vcvt.s32.f32 %v881_v10  ;;  %1476 = vst [vmem:[#allocation9 + $0x68] sm:$0xff] %v1313_v59  ;;  %v449_v31 = vmul.f32 0.5, %v382_v11 }
 0x18a   :  { %v1103_v56 = vmul.f32 %v1039_v8, %v639_v17  ;;  %v608_v51 = vadd.f32 0.5, %v544_v18  ;;  %v1137_v25 = vmul.f32 2.0, %v817_v46  ;;  %v1294_v45 = vmul.f32 %v1230_v48, %v638_v7  ;;  %v385_v18 = vpop.f32.mrf.mxu3 }
 0x18b   :  { %v1670_v29 = vpop.eup %1669  ;;  %v1009_v52 = vadd.f32 %v945_v43, %v817_v46  ;;  %v721_v0 = vunpack.c.2.s8 %v2013_v30  ;;  %v784_v55 = vshra.s32 %v720_v38, 1  ;;  %v912_v20 = vand.u32 1, %v720_v38 }
 0x18c   :  { %v1231_v53 = vsub.f32 %v1103_v56, %v1167_v15  ;;  %v1072_v47 = vmul.f32 %v1008_v63, %v608_v51  ;;  %v545_v27 = vmul.f32 0.5, %v1670_v29  ;;  %1673 = vtanh.f32 %v449_v31 }
 0x18d   :  { %v1672_v16 = vpop.eup %1671  ;;  %v785_v57 = vshra.s32 %v721_v0, 1  ;;  %v913_v44 = vand.u32 1, %v721_v0  ;;  %v848_v28 = vcvt.s32.f32 %v784_v55  ;;  %v976_v2 = vcvt.s32.f32 %v912_v20 }
 0x18e   :  { %v1295_v62 = vmul.f32 %v1231_v53, %v639_v17  ;;  %v1200_v34 = vsub.f32 %v1072_v47, %v1136_v50  ;;  %v609_v33 = vadd.f32 0.5, %v545_v27  ;;  %v576_v61 = vmul.f32 0.5, %v1672_v16 }
 0x18f   :  { %v849_v4 = vcvt.s32.f32 %v785_v57  ;;  %v977_v36 = vcvt.s32.f32 %v913_v44  ;;  %v1040_v15 = vadd.f32 %v976_v2, %v848_v28  ;;  %v1168_v22 = vmul.f32 2.0, %v848_v28 }
 0x190   :  { %v1329_v1 = vadd.f32 %v1295_v62, %v1294_v45  ;;  %v1073_v32 = vmul.f32 %v1009_v52, %v609_v33  ;;  %v640_v35 = vadd.f32 0.5, %v576_v61  ;;  %v1264_v14 = vmul.f32 %v1200_v34, %v608_v51 }
 0x191   :  { %v1041_v12 = vadd.f32 %v977_v36, %v849_v4  ;;  %v418_v8 = vmul.f32 0.5, %v224_v60  ;;  %v690_v6 = vunpack.c.3.s8 %v2005_v49  ;;  %v419_v24 = vmul.f32 0.5, %v337_v9 }
 0x192   :  { %1492 = vst [vmem:[#allocation9 + $0xe8] sm:$0xff] %v1329_v1  ;;  %v1201_v37 = vsub.f32 %v1073_v32, %v1137_v25  ;;  %v1674_v26 = vpop.eup %1673  ;;  %v1104_v7 = vmul.f32 %v1040_v15, %v640_v35  ;;  %v691_v19 = vunpack.c.3.s8 %v2008_v5  ;;  %v450_v39 = vmul.f32 0.5, %v272_v13 }
 0x193   :  { %v722_v40 = vunpack.c.3.s8 %v2011_v3  ;;  %v577_v23 = vmul.f32 0.5, %v1674_v26  ;;  %1675 = vtanh.f32 %v418_v8  ;;  %v754_v10 = vshra.s32 %v690_v6, 1 }
 0x194   :  { %v1265_v54 = vmul.f32 %v1201_v37, %v609_v33  ;;  %v1232_v42 = vsub.f32 %v1104_v7, %v1168_v22  ;;  %v882_v58 = vand.u32 1, %v690_v6  ;;  %1677 = vtanh.f32 %v419_v24 }
 0x195   :  { %v755_v21 = vshra.s32 %v691_v19, 1  ;;  %v641_v59 = vadd.f32 0.5, %v577_v23  ;;  %v1169_v17 = vmul.f32 2.0, %v849_v4  ;;  %v883_v49 = vand.u32 1, %v691_v19 }
 0x196   :  { %v1314_v41 = vadd.f32 %v1265_v54, %v1264_v14  ;;  %v818_v46 = vcvt.s32.f32 %v754_v10  ;;  %v946_v11 = vcvt.s32.f32 %v882_v58  ;;  %1679 = vtanh.f32 %v450_v39 }
 0x197   :  { %v1105_v5 = vmul.f32 %v1041_v12, %v641_v59  ;;  %v819_v48 = vcvt.s32.f32 %v755_v21  ;;  %v947_v3 = vcvt.s32.f32 %v883_v49  ;;  %v786_v63 = vshra.s32 %v722_v40, 1 }
 0x198   :  { %1477 = vst [vmem:[#allocation9 + $0x70] sm:$0xff] %v1314_v41  ;;  %v1296_v50 = vmul.f32 %v1232_v42, %v640_v35  ;;  %v914_v43 = vand.u32 1, %v722_v40  ;;  %v451_v56 = vmul.f32 0.5, %v385_v18  ;;  %v1138_v38 = vmul.f32 2.0, %v818_v46 }
 0x199   :  { %v1676_v51 = vpop.eup %1675  ;;  %v1233_v25 = vsub.f32 %v1105_v5, %v1169_v17  ;;  %v850_v29 = vcvt.s32.f32 %v786_v63  ;;  %v723_v45 = vunpack.c.3.s8 %v2013_v30  ;;  %v1010_v0 = vadd.f32 %v946_v11, %v818_v46 }
 0x19a   :  { %v1678_v52 = vpop.eup %1677  ;;  %v546_v31 = vmul.f32 0.5, %v1676_v51  ;;  %v978_v53 = vcvt.s32.f32 %v914_v43  ;;  %1681 = vtanh.f32 %v451_v56  ;;  %v1011_v55 = vadd.f32 %v947_v3, %v819_v48 }
 0x19b   :  { %v1297_v47 = vmul.f32 %v1233_v25, %v641_v59  ;;  %v547_v27 = vmul.f32 0.5, %v1678_v52  ;;  %v787_v16 = vshra.s32 %v723_v45, 1  ;;  %v1139_v44 = vmul.f32 2.0, %v819_v48 }
 0x19c   :  { %v1680_v20 = vpop.eup %1679  ;;  %v610_v57 = vadd.f32 0.5, %v546_v31  ;;  %v1042_v62 = vadd.f32 %v978_v53, %v850_v29  ;;  %v915_v34 = vand.u32 1, %v723_v45  ;;  %v1170_v9 = vmul.f32 2.0, %v850_v29 }
 0x19d   :  { %v1330_v33 = vadd.f32 %v1297_v47, %v1296_v50  ;;  %v611_v61 = vadd.f32 0.5, %v547_v27  ;;  %v578_v28 = vmul.f32 0.5, %v1680_v20  ;;  %v851_v2 = vcvt.s32.f32 %v787_v16 }
 0x19e   :  { %v1074_v4 = vmul.f32 %v1010_v0, %v610_v57  ;;  %v979_v30 = vcvt.s32.f32 %v915_v34 }
 0x19f   :  { %1493 = vst [vmem:[#allocation9 + $0xf0] sm:$0xff] %v1330_v33  ;;  %v1075_v36 = vmul.f32 %v1011_v55, %v611_v61  ;;  %v642_v60 = vadd.f32 0.5, %v578_v28  ;;  %v1171_v6 = vmul.f32 2.0, %v851_v2 }
 0x1a0   :  { %v1682_v1 = vpop.eup %1681  ;;  %v1202_v32 = vsub.f32 %v1074_v4, %v1138_v38  ;;  %v1043_v15 = vadd.f32 %v979_v30, %v851_v2 }
 0x1a1   :  { %v1203_v35 = vsub.f32 %v1075_v36, %v1139_v44  ;;  %v1106_v13 = vmul.f32 %v1042_v62, %v642_v60  ;;  %v579_v14 = vmul.f32 0.5, %v1682_v1 }
 0x1a2   :  { %v1266_v22 = vmul.f32 %v1202_v32, %v610_v57 }
 0x1a3   :  { %v1267_v12 = vmul.f32 %v1203_v35, %v611_v61  ;;  %v1234_v37 = vsub.f32 %v1106_v13, %v1170_v9  ;;  %v643_v8 = vadd.f32 0.5, %v579_v14 }
 0x1a5   :  { %v1315_v24 = vadd.f32 %v1267_v12, %v1266_v22  ;;  %v1107_v26 = vmul.f32 %v1043_v15, %v643_v8  ;;  %v1298_v7 = vmul.f32 %v1234_v37, %v642_v60 }
 0x1a7   :  { %1478 = vst [vmem:[#allocation9 + $0x78] sm:$0xff] %v1315_v24  ;;  %v1235_v19 = vsub.f32 %v1107_v26, %v1171_v6 }
 0x1a9   :  { %v1299_v39 = vmul.f32 %v1235_v19, %v643_v8 }
 0x1ab   :  { %v1331_v40 = vadd.f32 %v1299_v39, %v1298_v7 }
 0x1ad   :  { %1494 = vst [vmem:[#allocation9 + $0xf8] sm:$0xff] %v1331_v40 }
 0x1ae   :  { %1507 = dma.vmem_to_hbm [thread:$0]  %s1500_s29, 4096, %s1502_s5, [#allocation5], %s1786_s20, %s1786_s20, %s1787_s21  }
 0x1af   :  { %1783 = dma.done.wait [#allocation5], 4096  }
 0x1b0   :  { %1784 = vsyncadd [#allocation5], 4294963200 }
 0x1b1   :  { %1512 = vsyncpa [#allocation4], 1 }
 0x1b2   :  { %1513 = vsyncpa [#allocation7], 1 }
 0x1b3   :  { %1514 = vsyncpa [#allocation5], 1 }

</bundles_post_ra>
